<compile_context>
chip_gen: v7x
topology: tpu7x:2x2x1
jax: 0.10.0
libtpu: 0.0.40
codegen_flags: <defaults>
</compile_context>

<pallas_src>
import functools

import jax
import jax.numpy as jnp
from jax.experimental import pallas as pl
from jax.experimental.pallas import tpu as pltpu


# ---------------------------------------------------------------------------
# Compiler params / tiling helpers
# ---------------------------------------------------------------------------

# v7x has 64 MiB of physical VMEM (half of v5e/v6e); every block here is tiny, so an
# explicit 32 MiB scoped limit is safe on all generations.
_VMEM_LIMIT = 32 * 1024 * 1024


def _cparams(*sem):
    return pltpu.CompilerParams(dimension_semantics=tuple(sem),
                                vmem_limit_bytes=_VMEM_LIMIT)


def _row_tile(m, target=256):
    """Largest row tile <= target that divides m and is a multiple of 8
    (falls back to the full extent, which always satisfies the layout rule)."""
    if m <= target:
        return m
    t = (target // 8) * 8
    while t >= 8:
        if m % t == 0:
            return t
        t -= 8
    return m


# ---------------------------------------------------------------------------
# Pallas kernels
# ---------------------------------------------------------------------------

def _layernorm(y, g, b, eps=1e-5):
    mu = jnp.mean(y, axis=-1, keepdims=True)
    var = jnp.mean(jnp.square(y - mu), axis=-1, keepdims=True)
    return (y - mu) * jax.lax.rsqrt(var + eps) * g + b


def linear_kernel(x_ref, w_ref, b_ref, o_ref):
    # bf16 MXU inputs, f32 accumulation.
    x = x_ref[...].astype(jnp.bfloat16)
    acc = jnp.dot(x, w_ref[...], preferred_element_type=jnp.float32)
    o_ref[...] = (acc + b_ref[...]).astype(o_ref.dtype)


def linear_add_ln_kernel(x_ref, w_ref, b_ref, r_ref, g_ref, beta_ref, o_ref):
    # o = LayerNorm(x @ W + b + residual)
    x = x_ref[...].astype(jnp.bfloat16)
    y = jnp.dot(x, w_ref[...], preferred_element_type=jnp.float32) + b_ref[...]
    y = y + r_ref[...]
    o_ref[...] = _layernorm(y, g_ref[...], beta_ref[...]).astype(o_ref.dtype)


def ffn_add_ln_kernel(x_ref, w1_ref, b1_ref, w2_ref, b2_ref, g_ref, beta_ref, o_ref):
    # o = LayerNorm(relu(x @ W1 + b1) @ W2 + b2 + x)
    x = x_ref[...]
    h = jnp.dot(x.astype(jnp.bfloat16), w1_ref[...],
                preferred_element_type=jnp.float32) + b1_ref[...]
    h = jnp.maximum(h, 0.0)
    y = jnp.dot(h.astype(jnp.bfloat16), w2_ref[...],
                preferred_element_type=jnp.float32) + b2_ref[...]
    o_ref[...] = _layernorm(y + x, g_ref[...], beta_ref[...]).astype(o_ref.dtype)


def _attention_math(q, k, v, mask, heads, scale):
    # q: (Lq, E), k/v: (Lk, E) in f32; mask broadcastable to (H, Lq, Lk), True = keep.
    Lq, E = q.shape
    Lk = k.shape[0]
    hd = E // heads
    # (L, E) -> (H, L, d): heads become the batch dim of the MXU matmuls.
    q3 = q.reshape(Lq, heads, hd).transpose(1, 0, 2)
    k3 = k.reshape(Lk, heads, hd).transpose(1, 0, 2)
    v3 = v.reshape(Lk, heads, hd).transpose(1, 0, 2)
    energy = jnp.einsum('hqd,hkd->hqk', q3.astype(jnp.bfloat16),
                        k3.astype(jnp.bfloat16),
                        preferred_element_type=jnp.float32)
    # masked_fill BEFORE scaling, matching the torch reference.
    energy = jnp.where(mask, energy, jnp.float32(-1e20))
    energy = energy * (1.0 / scale)
    energy = energy - jnp.max(energy, axis=-1, keepdims=True)
    p = jnp.exp(energy)
    denom = jnp.sum(p, axis=-1, keepdims=True)
    attn = p * pl.reciprocal(denom, approx=True)
    out = jnp.einsum('hqk,hkd->hqd', attn.astype(jnp.bfloat16),
                     v3.astype(jnp.bfloat16),
                     preferred_element_type=jnp.float32)
    # (H, Lq, d) -> (Lq, H*d): lane-dense output (last dim = E).
    return out.transpose(1, 0, 2).reshape(Lq, E)


def attention_keymask_kernel(q_ref, k_ref, v_ref, m_ref, o_ref, *, heads, scale):
    mask = m_ref[...] != 0                       # (1, Lk), broadcasts over (H, Lq, Lk)
    o_ref[...] = _attention_math(q_ref[...], k_ref[...], v_ref[...], mask,
                                 heads, scale).astype(o_ref.dtype)


def attention_causal_kernel(q_ref, k_ref, v_ref, o_ref, *, heads, scale):
    Lq, Lk = q_ref.shape[0], k_ref.shape[0]
    row = jax.lax.broadcasted_iota(jnp.int32, (Lq, Lk), 0)
    col = jax.lax.broadcasted_iota(jnp.int32, (Lq, Lk), 1)
    o_ref[...] = _attention_math(q_ref[...], k_ref[...], v_ref[...], row >= col,
                                 heads, scale).astype(o_ref.dtype)


# ---------------------------------------------------------------------------
# Pallas wrappers
# ---------------------------------------------------------------------------
# TODO(synk): add K-reduction / N tiling (f32 VMEM accumulator with pl.when
# init/finalize) and a flash-style kv loop in attention for large K / vocab / seq.

def pallas_linear(x2d, w, b):
    M, K = x2d.shape
    N = w.shape[1]
    tm = _row_tile(M)
    return pl.pallas_call(
        linear_kernel,
        grid=(M // tm,),
        in_specs=[pl.BlockSpec((tm, K), lambda i: (i, 0)),
                  pl.BlockSpec((K, N), lambda i: (0, 0)),
                  pl.BlockSpec((1, N), lambda i: (0, 0))],
        out_specs=pl.BlockSpec((tm, N), lambda i: (i, 0)),
        out_shape=jax.ShapeDtypeStruct((M, N), jnp.float32),
        compiler_params=_cparams("parallel"),
    )(x2d, w, b.reshape(1, N))


def pallas_linear_add_ln(x2d, w, b, res2d, g, beta):
    M, K = x2d.shape
    N = w.shape[1]
    tm = _row_tile(M)
    return pl.pallas_call(
        linear_add_ln_kernel,
        grid=(M // tm,),
        in_specs=[pl.BlockSpec((tm, K), lambda i: (i, 0)),
                  pl.BlockSpec((K, N), lambda i: (0, 0)),
                  pl.BlockSpec((1, N), lambda i: (0, 0)),
                  pl.BlockSpec((tm, N), lambda i: (i, 0)),
                  pl.BlockSpec((1, N), lambda i: (0, 0)),
                  pl.BlockSpec((1, N), lambda i: (0, 0))],
        out_specs=pl.BlockSpec((tm, N), lambda i: (i, 0)),
        out_shape=jax.ShapeDtypeStruct((M, N), jnp.float32),
        compiler_params=_cparams("parallel"),
    )(x2d, w, b.reshape(1, N), res2d, g.reshape(1, N), beta.reshape(1, N))


def pallas_ffn_add_ln(x2d, w1, b1, w2, b2, g, beta):
    M, E = x2d.shape
    H = w1.shape[1]
    tm = _row_tile(M)
    return pl.pallas_call(
        ffn_add_ln_kernel,
        grid=(M // tm,),
        in_specs=[pl.BlockSpec((tm, E), lambda i: (i, 0)),
                  pl.BlockSpec((E, H), lambda i: (0, 0)),
                  pl.BlockSpec((1, H), lambda i: (0, 0)),
                  pl.BlockSpec((H, E), lambda i: (0, 0)),
                  pl.BlockSpec((1, E), lambda i: (0, 0)),
                  pl.BlockSpec((1, E), lambda i: (0, 0)),
                  pl.BlockSpec((1, E), lambda i: (0, 0))],
        out_specs=pl.BlockSpec((tm, E), lambda i: (i, 0)),
        out_shape=jax.ShapeDtypeStruct((M, E), jnp.float32),
        compiler_params=_cparams("parallel"),
    )(x2d, w1, b1.reshape(1, H), w2, b2.reshape(1, E),
      g.reshape(1, E), beta.reshape(1, E))


def pallas_attention(q, k, v, key_mask, *, embed_size, heads):
    """q,k,v: (N, L, E). key_mask: (N, 1, Lk) int32 key-padding mask, or None for
    a causal mask generated inside the kernel. Output: (N, Lq, E)."""
    N, Lq, E = q.shape
    Lk = k.shape[1]
    scale = float(embed_size) ** 0.5          # torch code scales by sqrt(embed_size)
    qspec = pl.BlockSpec((None, Lq, E), lambda n: (n, 0, 0))
    kspec = pl.BlockSpec((None, Lk, E), lambda n: (n, 0, 0))
    out_shape = jax.ShapeDtypeStruct((N, Lq, E), jnp.float32)
    if key_mask is not None:
        kern = functools.partial(attention_keymask_kernel, heads=heads, scale=scale)
        return pl.pallas_call(
            kern, grid=(N,),
            in_specs=[qspec, kspec, kspec,
                      pl.BlockSpec((None, 1, Lk), lambda n: (n, 0, 0))],
            out_specs=qspec,
            out_shape=out_shape,
            compiler_params=_cparams("parallel"),
        )(q, k, v, key_mask)
    kern = functools.partial(attention_causal_kernel, heads=heads, scale=scale)
    return pl.pallas_call(
        kern, grid=(N,),
        in_specs=[qspec, kspec, kspec],
        out_specs=qspec,
        out_shape=out_shape,
        compiler_params=_cparams("parallel"),
    )(q, k, v)


# ---------------------------------------------------------------------------
# Model (forward pass mirroring the PyTorch module structure)
# ---------------------------------------------------------------------------

def self_attention(p, values, keys, query, key_mask, embed_size, heads):
    """Per-head attention output (pre-fc_out), flattened to (N*Lq, E).
    key_mask=None -> causal (target) mask built inside the kernel."""
    N, Lq, E = query.shape
    Lk = keys.shape[1]
    w_qkv, b_qkv = p['w_qkv'], p['b_qkv']
    if (query is keys) and (keys is values):
        # Fully fused QKV projection: one matmul with N = 3E.
        qkv = pallas_linear(query.reshape(-1, E), w_qkv, b_qkv).reshape(N, Lq, 3 * E)
        q, k, v = qkv[..., :E], qkv[..., E:2 * E], qkv[..., 2 * E:]
    elif keys is values:
        # Cross-attention: fuse K and V projections over the shared memory tensor.
        q = pallas_linear(query.reshape(-1, E), w_qkv[:, :E], b_qkv[:E]).reshape(N, Lq, E)
        kv = pallas_linear(keys.reshape(-1, E), w_qkv[:, E:], b_qkv[E:]).reshape(N, Lk, 2 * E)
        k, v = kv[..., :E], kv[..., E:]
    else:
        q = pallas_linear(query.reshape(-1, E), w_qkv[:, :E], b_qkv[:E]).reshape(N, Lq, E)
        k = pallas_linear(keys.reshape(-1, E), w_qkv[:, E:2 * E], b_qkv[E:2 * E]).reshape(N, Lk, E)
        v = pallas_linear(values.reshape(-1, E), w_qkv[:, 2 * E:], b_qkv[2 * E:]).reshape(N, Lk, E)
    out = pallas_attention(q, k, v, key_mask, embed_size=embed_size, heads=heads)
    return out.reshape(N * Lq, E)


def transformer_block(p, value, key, query, key_mask, embed_size, heads):
    N, Lq, E = query.shape
    attn = self_attention(p['attn'], value, key, query, key_mask, embed_size, heads)
    # x = LayerNorm(fc_out(attn) + query)   -- fused projection + residual + LN
    x = pallas_linear_add_ln(attn, p['attn']['wo'], p['attn']['bo'],
                             query.reshape(-1, E), p['ln1_g'], p['ln1_b'])
    # out = LayerNorm(FFN(x) + x)           -- fused FFN + residual + LN
    out = pallas_ffn_add_ln(x, p['w1'], p['b1'], p['w2'], p['b2'],
                            p['ln2_g'], p['ln2_b'])
    return out.reshape(N, Lq, E)


def decoder_block(p, x, value, key, src_key_mask, embed_size, heads):
    N, L, E = x.shape
    attn = self_attention(p['attn'], x, x, x, None, embed_size, heads)   # causal
    query = pallas_linear_add_ln(attn, p['attn']['wo'], p['attn']['bo'],
                                 x.reshape(-1, E), p['ln_g'], p['ln_b']).reshape(N, L, E)
    return transformer_block(p['tb'], value, key, query, src_key_mask, embed_size, heads)


def encoder_forward(p, tokens, key_mask, embed_size, heads):
    N, L = tokens.shape
    positions = jnp.broadcast_to(jnp.arange(L), (N, L))
    out = jnp.take(p['word_emb'], tokens, axis=0) + jnp.take(p['pos_emb'], positions, axis=0)
    for layer in p['layers']:
        out = transformer_block(layer, out, out, out, key_mask, embed_size, heads)
    return out


def decoder_forward(p, tokens, enc_out, src_key_mask, embed_size, heads):
    N, L = tokens.shape
    positions = jnp.broadcast_to(jnp.arange(L), (N, L))
    x = jnp.take(p['word_emb'], tokens, axis=0) + jnp.take(p['pos_emb'], positions, axis=0)
    for layer in p['layers']:
        x = decoder_block(layer, x, enc_out, enc_out, src_key_mask, embed_size, heads)
    E = x.shape[-1]
    out = pallas_linear(x.reshape(-1, E), p['fc_w'], p['fc_b'])
    return out.reshape(N, L, -1)


@functools.partial(jax.jit,
                   static_argnames=("src_pad_idx", "trg_pad_idx", "embed_size", "heads"))
def transformer_forward(params, src, trg, *, src_pad_idx, trg_pad_idx, embed_size, heads):
    # Compact (N, 1, src_len) int32 key-padding mask; causal target mask is
    # generated inside the attention kernel (no (N,H,Lq,Lk) HBM buffer).
    src_key_mask = (src != src_pad_idx).astype(jnp.int32)[:, None, :]
    enc_src = encoder_forward(params['encoder'], src, src_key_mask, embed_size, heads)
    return decoder_forward(params['decoder'], trg, enc_src, src_key_mask,
                           embed_size, heads)


# ---------------------------------------------------------------------------
# Deterministic parameter init (PyTorch-style fan-in bounds)
# ---------------------------------------------------------------------------

def init_linear(key, fan_in, fan_out):
    kw, kb = jax.random.split(key)
    bound = 1.0 / (fan_in ** 0.5)
    w = jax.random.uniform(kw, (fan_in, fan_out), jnp.float32, -bound, bound)
    b = jax.random.uniform(kb, (fan_out,), jnp.float32, -bound, bound)
    return w, b


def init_self_attention(key, E):
    ks = jax.random.split(key, 4)
    wv, bv = init_linear(ks[0], E, E)
    wk, bk = init_linear(ks[1], E, E)
    wq, bq = init_linear(ks[2], E, E)
    wo, bo = init_linear(ks[3], E, E)
    # Fused QKV weight [E, 3E] (q | k | v). Matmul weights stored bf16 (MXU-native,
    # halves weight DMA); biases / LN params stay f32.
    return dict(
        w_qkv=jnp.concatenate([wq, wk, wv], axis=1).astype(jnp.bfloat16),
        b_qkv=jnp.concatenate([bq, bk, bv]),
        wo=wo.astype(jnp.bfloat16), bo=bo)


def init_transformer_block(key, E, fwd_exp):
    ks = jax.random.split(key, 3)
    w1, b1 = init_linear(ks[1], E, fwd_exp * E)
    w2, b2 = init_linear(ks[2], fwd_exp * E, E)
    return dict(attn=init_self_attention(ks[0], E),
                ln1_g=jnp.ones((E,), jnp.float32), ln1_b=jnp.zeros((E,), jnp.float32),
                ln2_g=jnp.ones((E,), jnp.float32), ln2_b=jnp.zeros((E,), jnp.float32),
                w1=w1.astype(jnp.bfloat16), b1=b1,
                w2=w2.astype(jnp.bfloat16), b2=b2)


def init_decoder_block(key, E, fwd_exp):
    ks = jax.random.split(key, 2)
    return dict(attn=init_self_attention(ks[0], E),
                ln_g=jnp.ones((E,), jnp.float32), ln_b=jnp.zeros((E,), jnp.float32),
                tb=init_transformer_block(ks[1], E, fwd_exp))


def init_transformer(key, src_vocab, trg_vocab, E, num_layers, fwd_exp, max_len):
    k_enc, k_dec = jax.random.split(key)
    ks = jax.random.split(k_enc, num_layers + 2)
    enc = dict(
        word_emb=jax.random.normal(ks[0], (src_vocab, E), jnp.float32),
        pos_emb=jax.random.normal(ks[1], (max_len, E), jnp.float32),
        layers=[init_transformer_block(ks[2 + i], E, fwd_exp) for i in range(num_layers)],
    )
    kd = jax.random.split(k_dec, num_layers + 3)
    fc_w, fc_b = init_linear(kd[2], E, trg_vocab)
    dec = dict(
        word_emb=jax.random.normal(kd[0], (trg_vocab, E), jnp.float32),
        pos_emb=jax.random.normal(kd[1], (max_len, E), jnp.float32),
        fc_w=fc_w.astype(jnp.bfloat16), fc_b=fc_b,
        layers=[init_decoder_block(kd[3 + i], E, fwd_exp) for i in range(num_layers)],
    )
    return dict(encoder=enc, decoder=dec)


# ---------------------------------------------------------------------------
# Main
# ---------------------------------------------------------------------------

if __name__ == "__main__":
    SRC_VOCAB = 16
    TRG_VOCAB = 18
    SRC_PAD_IDX = 0
    TRG_PAD_IDX = 0
    EMBED_SIZE = 32
    NUM_LAYERS = 2
    FWD_EXP = 2
    HEADS = 4
    MAX_LEN = 16
    BATCH = 2
    SRC_LEN = 8
    TRG_LEN = 8

    key = jax.random.PRNGKey(0)
    k_params, k_src, k_trg = jax.random.split(key, 3)

    params = init_transformer(k_params, SRC_VOCAB, TRG_VOCAB, EMBED_SIZE,
                              NUM_LAYERS, FWD_EXP, MAX_LEN)

    src = jax.random.randint(k_src, (BATCH, SRC_LEN), 1, SRC_VOCAB, dtype=jnp.int32)
    trg = jax.random.randint(k_trg, (BATCH, TRG_LEN), 1, TRG_VOCAB, dtype=jnp.int32)
    # include some padding in src so src_mask actually masks something
    src = src.at[:, -2:].set(SRC_PAD_IDX)

    out = transformer_forward(params, src, trg,
                              src_pad_idx=SRC_PAD_IDX, trg_pad_idx=TRG_PAD_IDX,
                              embed_size=EMBED_SIZE, heads=HEADS)
    out = jax.block_until_ready(out)

    assert out.shape == (BATCH, TRG_LEN, TRG_VOCAB), out.shape
    assert bool(jnp.all(jnp.isfinite(out)))
    print("KERNEL_OK")
</pallas_src>

<mosaic_0001>
module attributes {stable_mosaic.version = 11 : i64} {
  func.func @linear_kernel(%arg0: i32, %arg1: memref<16x32xf32, #tpu.memory_space<vmem>>, %arg2: memref<32x96xbf16, #tpu.memory_space<vmem>>, %arg3: memref<1x96xf32, #tpu.memory_space<vmem>>, %arg4: memref<16x96xf32, #tpu.memory_space<vmem>>) attributes {dimension_semantics = [#tpu.dimension_semantics<parallel>], iteration_bounds = array<i64: 1>, scalar_prefetch = 0 : i64, scratch_operands = 0 : i64, tpu.core_type = #tpu.core_type<tc>, window_params = [{transform_indices = @transform_0, window_bounds = array<i64: 16, 32>}, {pipeline_mode = #tpu.pipeline_mode<synchronous>, transform_indices = @transform_1, window_bounds = array<i64: 32, 96>}, {pipeline_mode = #tpu.pipeline_mode<synchronous>, transform_indices = @transform_2, window_bounds = array<i64: 1, 96>}, {transform_indices = @transform_3, window_bounds = array<i64: 16, 96>}]} {
    %c0 = arith.constant 0 : index
    %c0_0 = arith.constant 0 : index
    %0 = vector.load %arg1[%c0, %c0_0] : memref<16x32xf32, #tpu.memory_space<vmem>>, vector<16x32xf32>
    %1 = arith.truncf %0 : vector<16x32xf32> to vector<16x32xbf16>
    %c0_1 = arith.constant 0 : index
    %c0_2 = arith.constant 0 : index
    %2 = vector.load %arg2[%c0_1, %c0_2] : memref<32x96xbf16, #tpu.memory_space<vmem>>, vector<32x96xbf16>
    %cst = arith.constant dense<0.000000e+00> : vector<16x96xf32>
    %3 = tpu.matmul %1, %2, %cst {dimension_numbers = #tpu.dot_dimension_numbers<[1], [0], [0], [1], [0, 0, 1, 1], [], []>} : vector<16x32xbf16>, vector<32x96xbf16>, vector<16x96xf32> -> vector<16x96xf32>
    %c0_3 = arith.constant 0 : index
    %c0_4 = arith.constant 0 : index
    %4 = vector.load %arg3[%c0_3, %c0_4] : memref<1x96xf32, #tpu.memory_space<vmem>>, vector<1x96xf32>
    %5 = vector.broadcast %4 : vector<1x96xf32> to vector<16x96xf32>
    %6 = arith.addf %3, %5 : vector<16x96xf32>
    %c0_5 = arith.constant 0 : index
    %c0_6 = arith.constant 0 : index
    %7 = vector.load %arg4[%c0_5, %c0_6] : memref<16x96xf32, #tpu.memory_space<vmem>>, vector<16x96xf32>
    tpu.vector_store %arg4[%c0_5, %c0_6], %6 {strides = array<i32>} : memref<16x96xf32, #tpu.memory_space<vmem>>, vector<16x96xf32>,
    return
  }
  func.func @transform_0(%arg0: i32) -> (i32, i32) {
    %c0_i32 = arith.constant 0 : i32
    %c0_i32_0 = arith.constant 0 : i32
    return %arg0, %c0_i32 : i32, i32
  }
  func.func @transform_1(%arg0: i32) -> (i32, i32) {
    %c0_i32 = arith.constant 0 : i32
    %c0_i32_0 = arith.constant 0 : i32
    %c0_i32_1 = arith.constant 0 : i32
    return %c0_i32, %c0_i32_0 : i32, i32
  }
  func.func @transform_2(%arg0: i32) -> (i32, i32) {
    %c0_i32 = arith.constant 0 : i32
    %c0_i32_0 = arith.constant 0 : i32
    %c0_i32_1 = arith.constant 0 : i32
    return %c0_i32, %c0_i32_0 : i32, i32
  }
  func.func @transform_3(%arg0: i32) -> (i32, i32) {
    %c0_i32 = arith.constant 0 : i32
    %c0_i32_0 = arith.constant 0 : i32
    return %arg0, %c0_i32 : i32, i32
  }
}

module attributes {stable_mosaic.version = 11 : i64} {
  func.func @attention_causal_kernel(%arg0: i32, %arg1: memref<1x8x32xf32, #tpu.memory_space<vmem>>, %arg2: memref<1x8x32xf32, #tpu.memory_space<vmem>>, %arg3: memref<1x8x32xf32, #tpu.memory_space<vmem>>, %arg4: memref<1x8x32xf32, #tpu.memory_space<vmem>>) attributes {dimension_semantics = [#tpu.dimension_semantics<parallel>], iteration_bounds = array<i64: 2>, scalar_prefetch = 0 : i64, scratch_operands = 0 : i64, tpu.core_type = #tpu.core_type<tc>, window_params = [{transform_indices = @transform_0, window_bounds = array<i64: 1, 8, 32>}, {transform_indices = @transform_1, window_bounds = array<i64: 1, 8, 32>}, {transform_indices = @transform_2, window_bounds = array<i64: 1, 8, 32>}, {transform_indices = @transform_3, window_bounds = array<i64: 1, 8, 32>}]} {
    %0 = tpu.iota {dimensions = array<i32: 0>} : vector<8x8xi32>
    %1 = tpu.iota {dimensions = array<i32: 1>} : vector<8x8xi32>
    %c0 = arith.constant 0 : index
    %c0_0 = arith.constant 0 : index
    %c0_1 = arith.constant 0 : index
    %2 = vector.load %arg1[%c0, %c0_0, %c0_1] : memref<1x8x32xf32, #tpu.memory_space<vmem>>, vector<1x8x32xf32>
    %3 = vector.shape_cast %2 : vector<1x8x32xf32> to vector<8x32xf32>
    %c0_2 = arith.constant 0 : index
    %c0_3 = arith.constant 0 : index
    %c0_4 = arith.constant 0 : index
    %4 = vector.load %arg2[%c0_2, %c0_3, %c0_4] : memref<1x8x32xf32, #tpu.memory_space<vmem>>, vector<1x8x32xf32>
    %5 = vector.shape_cast %4 : vector<1x8x32xf32> to vector<8x32xf32>
    %c0_5 = arith.constant 0 : index
    %c0_6 = arith.constant 0 : index
    %c0_7 = arith.constant 0 : index
    %6 = vector.load %arg3[%c0_5, %c0_6, %c0_7] : memref<1x8x32xf32, #tpu.memory_space<vmem>>, vector<1x8x32xf32>
    %7 = vector.shape_cast %6 : vector<1x8x32xf32> to vector<8x32xf32>
    %8 = arith.cmpi sge, %0, %1 : vector<8x8xi32>
    %9 = vector.shape_cast %3 : vector<8x32xf32> to vector<8x4x8xf32>
    %10 = tpu.transpose %9, [1, 0, 2] : vector<8x4x8xf32> -> vector<4x8x8xf32>
    %11 = vector.shape_cast %5 : vector<8x32xf32> to vector<8x4x8xf32>
    %12 = tpu.transpose %11, [1, 0, 2] : vector<8x4x8xf32> -> vector<4x8x8xf32>
    %13 = vector.shape_cast %7 : vector<8x32xf32> to vector<8x4x8xf32>
    %14 = tpu.transpose %13, [1, 0, 2] : vector<8x4x8xf32> -> vector<4x8x8xf32>
    %15 = arith.truncf %10 : vector<4x8x8xf32> to vector<4x8x8xbf16>
    %16 = arith.truncf %12 : vector<4x8x8xf32> to vector<4x8x8xbf16>
    "tpu.trace_start"() <{level = 10 : i32, message = "hqd,hkd->hqk"}> : () -> ()
    %cst = arith.constant dense<0.000000e+00> : vector<4x8x8xf32>
    %17 = tpu.matmul %15, %16, %cst {dimension_numbers = #tpu.dot_dimension_numbers<[2], [2], [1], [1], [0, 0, 0, 1, 1, 1], [0], [0]>} : vector<4x8x8xbf16>, vector<4x8x8xbf16>, vector<4x8x8xf32> -> vector<4x8x8xf32>
    %cst_8 = arith.constant -1.000000e+20 : f32
    "tpu.trace_stop"() : () -> ()
    %18 = vector.shape_cast %8 : vector<8x8xi1> to vector<1x8x8xi1>
    %19 = vector.broadcast %18 : vector<1x8x8xi1> to vector<4x8x8xi1>
    %20 = vector.broadcast %cst_8 : f32 to vector<4x8x8xf32>
    %21 = arith.select %19, %17, %20 : vector<4x8x8xi1>, vector<4x8x8xf32>
    %cst_9 = arith.constant 0.176776692 : f32
    %22 = vector.broadcast %cst_9 : f32 to vector<4x8x8xf32>
    %23 = arith.mulf %21, %22 : vector<4x8x8xf32>
    %cst_10 = arith.constant dense<0xFF800000> : vector<4x8xf32>
    %24 = vector.multi_reduction <maximumf>, %23, %cst_10 [2] : vector<4x8x8xf32> to vector<4x8xf32>
    %25 = vector.shape_cast %24 : vector<4x8xf32> to vector<4x8x1xf32>
    %26 = vector.broadcast %25 : vector<4x8x1xf32> to vector<4x8x8xf32>
    %27 = arith.subf %23, %26 : vector<4x8x8xf32>
    %28 = math.exp %27 : vector<4x8x8xf32>
    %cst_11 = arith.constant dense<0.000000e+00> : vector<4x8xf32>
    %29 = vector.multi_reduction <add>, %28, %cst_11 [2] : vector<4x8x8xf32> to vector<4x8xf32>
    %30 = vector.shape_cast %29 : vector<4x8xf32> to vector<4x8x1xf32>
    %31 = tpu.reciprocal %30 {approx = true} : vector<4x8x1xf32> -> vector<4x8x1xf32>
    %32 = vector.broadcast %31 : vector<4x8x1xf32> to vector<4x8x8xf32>
    %33 = arith.mulf %28, %32 : vector<4x8x8xf32>
    %34 = arith.truncf %33 : vector<4x8x8xf32> to vector<4x8x8xbf16>
    %35 = arith.truncf %14 : vector<4x8x8xf32> to vector<4x8x8xbf16>
    "tpu.trace_start"() <{level = 10 : i32, message = "hqk,hkd->hqd"}> : () -> ()
    %cst_12 = arith.constant dense<0.000000e+00> : vector<4x8x8xf32>
    %36 = tpu.matmul %34, %35, %cst_12 {dimension_numbers = #tpu.dot_dimension_numbers<[2], [1], [1], [2], [0, 0, 0, 1, 1, 2], [0], [0]>} : vector<4x8x8xbf16>, vector<4x8x8xbf16>, vector<4x8x8xf32> -> vector<4x8x8xf32>
    "tpu.trace_stop"() : () -> ()
    %37 = tpu.transpose %36, [1, 0, 2] : vector<4x8x8xf32> -> vector<8x4x8xf32>
    %38 = vector.shape_cast %37 : vector<8x4x8xf32> to vector<8x32xf32>
    %c0_13 = arith.constant 0 : index
    %c0_14 = arith.constant 0 : index
    %c0_15 = arith.constant 0 : index
    %39 = vector.load %arg4[%c0_13, %c0_14, %c0_15] : memref<1x8x32xf32, #tpu.memory_space<vmem>>, vector<1x8x32xf32>
    %40 = vector.shape_cast %39 : vector<1x8x32xf32> to vector<8x32xf32>
    %41 = vector.shape_cast %38 : vector<8x32xf32> to vector<1x8x32xf32>
    tpu.vector_store %arg4[%c0_13, %c0_14, %c0_15], %41 {strides = array<i32>} : memref<1x8x32xf32, #tpu.memory_space<vmem>>, vector<1x8x32xf32>,
    return
  }
  func.func @transform_0(%arg0: i32) -> (i32, i32, i32) {
    %c0_i32 = arith.constant 0 : i32
    %c0_i32_0 = arith.constant 0 : i32
    %c0_i32_1 = arith.constant 0 : i32
    return %arg0, %c0_i32, %c0_i32_0 : i32, i32, i32
  }
  func.func @transform_1(%arg0: i32) -> (i32, i32, i32) {
    %c0_i32 = arith.constant 0 : i32
    %c0_i32_0 = arith.constant 0 : i32
    %c0_i32_1 = arith.constant 0 : i32
    return %arg0, %c0_i32, %c0_i32_0 : i32, i32, i32
  }
  func.func @transform_2(%arg0: i32) -> (i32, i32, i32) {
    %c0_i32 = arith.constant 0 : i32
    %c0_i32_0 = arith.constant 0 : i32
    %c0_i32_1 = arith.constant 0 : i32
    return %arg0, %c0_i32, %c0_i32_0 : i32, i32, i32
  }
  func.func @transform_3(%arg0: i32) -> (i32, i32, i32) {
    %c0_i32 = arith.constant 0 : i32
    %c0_i32_0 = arith.constant 0 : i32
    %c0_i32_1 = arith.constant 0 : i32
    return %arg0, %c0_i32, %c0_i32_0 : i32, i32, i32
  }
}

module attributes {stable_mosaic.version = 11 : i64} {
  func.func @linear_add_ln_kernel(%arg0: i32, %arg1: memref<16x32xf32, #tpu.memory_space<vmem>>, %arg2: memref<32x32xbf16, #tpu.memory_space<vmem>>, %arg3: memref<1x32xf32, #tpu.memory_space<vmem>>, %arg4: memref<16x32xf32, #tpu.memory_space<vmem>>, %arg5: memref<1x32xf32, #tpu.memory_space<vmem>>, %arg6: memref<1x32xf32, #tpu.memory_space<vmem>>, %arg7: memref<16x32xf32, #tpu.memory_space<vmem>>) attributes {dimension_semantics = [#tpu.dimension_semantics<parallel>], iteration_bounds = array<i64: 1>, scalar_prefetch = 0 : i64, scratch_operands = 0 : i64, tpu.core_type = #tpu.core_type<tc>, window_params = [{transform_indices = @transform_0, window_bounds = array<i64: 16, 32>}, {pipeline_mode = #tpu.pipeline_mode<synchronous>, transform_indices = @transform_1, window_bounds = array<i64: 32, 32>}, {pipeline_mode = #tpu.pipeline_mode<synchronous>, transform_indices = @transform_2, window_bounds = array<i64: 1, 32>}, {transform_indices = @transform_3, window_bounds = array<i64: 16, 32>}, {pipeline_mode = #tpu.pipeline_mode<synchronous>, transform_indices = @transform_4, window_bounds = array<i64: 1, 32>}, {pipeline_mode = #tpu.pipeline_mode<synchronous>, transform_indices = @transform_5, window_bounds = array<i64: 1, 32>}, {transform_indices = @transform_6, window_bounds = array<i64: 16, 32>}]} {
    %c0 = arith.constant 0 : index
    %c0_0 = arith.constant 0 : index
    %0 = vector.load %arg1[%c0, %c0_0] : memref<16x32xf32, #tpu.memory_space<vmem>>, vector<16x32xf32>
    %1 = arith.truncf %0 : vector<16x32xf32> to vector<16x32xbf16>
    %c0_1 = arith.constant 0 : index
    %c0_2 = arith.constant 0 : index
    %2 = vector.load %arg2[%c0_1, %c0_2] : memref<32x32xbf16, #tpu.memory_space<vmem>>, vector<32x32xbf16>
    %cst = arith.constant dense<0.000000e+00> : vector<16x32xf32>
    %3 = tpu.matmul %1, %2, %cst {dimension_numbers = #tpu.dot_dimension_numbers<[1], [0], [0], [1], [0, 0, 1, 1], [], []>} : vector<16x32xbf16>, vector<32x32xbf16>, vector<16x32xf32> -> vector<16x32xf32>
    %c0_3 = arith.constant 0 : index
    %c0_4 = arith.constant 0 : index
    %4 = vector.load %arg3[%c0_3, %c0_4] : memref<1x32xf32, #tpu.memory_space<vmem>>, vector<1x32xf32>
    %5 = vector.broadcast %4 : vector<1x32xf32> to vector<16x32xf32>
    %6 = arith.addf %3, %5 : vector<16x32xf32>
    %c0_5 = arith.constant 0 : index
    %c0_6 = arith.constant 0 : index
    %7 = vector.load %arg4[%c0_5, %c0_6] : memref<16x32xf32, #tpu.memory_space<vmem>>, vector<16x32xf32>
    %8 = arith.addf %6, %7 : vector<16x32xf32>
    %c0_7 = arith.constant 0 : index
    %c0_8 = arith.constant 0 : index
    %9 = vector.load %arg5[%c0_7, %c0_8] : memref<1x32xf32, #tpu.memory_space<vmem>>, vector<1x32xf32>
    %c0_9 = arith.constant 0 : index
    %c0_10 = arith.constant 0 : index
    %10 = vector.load %arg6[%c0_9, %c0_10] : memref<1x32xf32, #tpu.memory_space<vmem>>, vector<1x32xf32>
    %cst_11 = arith.constant dense<0.000000e+00> : vector<16xf32>
    %11 = vector.multi_reduction <add>, %8, %cst_11 [1] : vector<16x32xf32> to vector<16xf32>
    %12 = vector.shape_cast %11 : vector<16xf32> to vector<16x1xf32>
    %cst_12 = arith.constant 3.200000e+01 : f32
    %13 = vector.broadcast %cst_12 : f32 to vector<16x1xf32>
    %14 = arith.divf %12, %13 : vector<16x1xf32>
    %15 = vector.broadcast %14 : vector<16x1xf32> to vector<16x32xf32>
    %16 = arith.subf %8, %15 : vector<16x32xf32>
    %17 = arith.mulf %16, %16 : vector<16x32xf32>
    %cst_13 = arith.constant dense<0.000000e+00> : vector<16xf32>
    %18 = vector.multi_reduction <add>, %17, %cst_13 [1] : vector<16x32xf32> to vector<16xf32>
    %19 = vector.shape_cast %18 : vector<16xf32> to vector<16x1xf32>
    %cst_14 = arith.constant 3.200000e+01 : f32
    %20 = vector.broadcast %cst_14 : f32 to vector<16x1xf32>
    %21 = arith.divf %19, %20 : vector<16x1xf32>
    %22 = vector.broadcast %14 : vector<16x1xf32> to vector<16x32xf32>
    %23 = arith.subf %8, %22 : vector<16x32xf32>
    %cst_15 = arith.constant 9.99999974E-6 : f32
    %24 = vector.broadcast %cst_15 : f32 to vector<16x1xf32>
    %25 = arith.addf %21, %24 : vector<16x1xf32>
    %26 = math.rsqrt %25 : vector<16x1xf32>
    %27 = vector.broadcast %26 : vector<16x1xf32> to vector<16x32xf32>
    %28 = arith.mulf %23, %27 : vector<16x32xf32>
    %29 = vector.broadcast %9 : vector<1x32xf32> to vector<16x32xf32>
    %30 = arith.mulf %28, %29 : vector<16x32xf32>
    %31 = vector.broadcast %10 : vector<1x32xf32> to vector<16x32xf32>
    %32 = arith.addf %30, %31 : vector<16x32xf32>
    %c0_16 = arith.constant 0 : index
    %c0_17 = arith.constant 0 : index
    %33 = vector.load %arg7[%c0_16, %c0_17] : memref<16x32xf32, #tpu.memory_space<vmem>>, vector<16x32xf32>
    tpu.vector_store %arg7[%c0_16, %c0_17], %32 {strides = array<i32>} : memref<16x32xf32, #tpu.memory_space<vmem>>, vector<16x32xf32>,
    return
  }
  func.func @transform_0(%arg0: i32) -> (i32, i32) {
    %c0_i32 = arith.constant 0 : i32
    %c0_i32_0 = arith.constant 0 : i32
    return %arg0, %c0_i32 : i32, i32
  }
  func.func @transform_1(%arg0: i32) -> (i32, i32) {
    %c0_i32 = arith.constant 0 : i32
    %c0_i32_0 = arith.constant 0 : i32
    %c0_i32_1 = arith.constant 0 : i32
    return %c0_i32, %c0_i32_0 : i32, i32
  }
  func.func @transform_2(%arg0: i32) -> (i32, i32) {
    %c0_i32 = arith.constant 0 : i32
    %c0_i32_0 = arith.constant 0 : i32
    %c0_i32_1 = arith.constant 0 : i32
    return %c0_i32, %c0_i32_0 : i32, i32
  }
  func.func @transform_3(%arg0: i32) -> (i32, i32) {
    %c0_i32 = arith.constant 0 : i32
    %c0_i32_0 = arith.constant 0 : i32
    return %arg0, %c0_i32 : i32, i32
  }
  func.func @transform_4(%arg0: i32) -> (i32, i32) {
    %c0_i32 = arith.constant 0 : i32
    %c0_i32_0 = arith.constant 0 : i32
    %c0_i32_1 = arith.constant 0 : i32
    return %c0_i32, %c0_i32_0 : i32, i32
  }
  func.func @transform_5(%arg0: i32) -> (i32, i32) {
    %c0_i32 = arith.constant 0 : i32
    %c0_i32_0 = arith.constant 0 : i32
    %c0_i32_1 = arith.constant 0 : i32
    return %c0_i32, %c0_i32_0 : i32, i32
  }
  func.func @transform_6(%arg0: i32) -> (i32, i32) {
    %c0_i32 = arith.constant 0 : i32
    %c0_i32_0 = arith.constant 0 : i32
    return %arg0, %c0_i32 : i32, i32
  }
}

module attributes {stable_mosaic.version = 11 : i64} {
  func.func @linear_kernel(%arg0: i32, %arg1: memref<16x32xf32, #tpu.memory_space<vmem>>, %arg2: memref<32x32xbf16, #tpu.memory_space<vmem>>, %arg3: memref<1x32xf32, #tpu.memory_space<vmem>>, %arg4: memref<16x32xf32, #tpu.memory_space<vmem>>) attributes {dimension_semantics = [#tpu.dimension_semantics<parallel>], iteration_bounds = array<i64: 1>, scalar_prefetch = 0 : i64, scratch_operands = 0 : i64, tpu.core_type = #tpu.core_type<tc>, window_params = [{transform_indices = @transform_0, window_bounds = array<i64: 16, 32>}, {pipeline_mode = #tpu.pipeline_mode<synchronous>, transform_indices = @transform_1, window_bounds = array<i64: 32, 32>}, {pipeline_mode = #tpu.pipeline_mode<synchronous>, transform_indices = @transform_2, window_bounds = array<i64: 1, 32>}, {transform_indices = @transform_3, window_bounds = array<i64: 16, 32>}]} {
    %c0 = arith.constant 0 : index
    %c0_0 = arith.constant 0 : index
    %0 = vector.load %arg1[%c0, %c0_0] : memref<16x32xf32, #tpu.memory_space<vmem>>, vector<16x32xf32>
    %1 = arith.truncf %0 : vector<16x32xf32> to vector<16x32xbf16>
    %c0_1 = arith.constant 0 : index
    %c0_2 = arith.constant 0 : index
    %2 = vector.load %arg2[%c0_1, %c0_2] : memref<32x32xbf16, #tpu.memory_space<vmem>>, vector<32x32xbf16>
    %cst = arith.constant dense<0.000000e+00> : vector<16x32xf32>
    %3 = tpu.matmul %1, %2, %cst {dimension_numbers = #tpu.dot_dimension_numbers<[1], [0], [0], [1], [0, 0, 1, 1], [], []>} : vector<16x32xbf16>, vector<32x32xbf16>, vector<16x32xf32> -> vector<16x32xf32>
    %c0_3 = arith.constant 0 : index
    %c0_4 = arith.constant 0 : index
    %4 = vector.load %arg3[%c0_3, %c0_4] : memref<1x32xf32, #tpu.memory_space<vmem>>, vector<1x32xf32>
    %5 = vector.broadcast %4 : vector<1x32xf32> to vector<16x32xf32>
    %6 = arith.addf %3, %5 : vector<16x32xf32>
    %c0_5 = arith.constant 0 : index
    %c0_6 = arith.constant 0 : index
    %7 = vector.load %arg4[%c0_5, %c0_6] : memref<16x32xf32, #tpu.memory_space<vmem>>, vector<16x32xf32>
    tpu.vector_store %arg4[%c0_5, %c0_6], %6 {strides = array<i32>} : memref<16x32xf32, #tpu.memory_space<vmem>>, vector<16x32xf32>,
    return
  }
  func.func @transform_0(%arg0: i32) -> (i32, i32) {
    %c0_i32 = arith.constant 0 : i32
    %c0_i32_0 = arith.constant 0 : i32
    return %arg0, %c0_i32 : i32, i32
  }
  func.func @transform_1(%arg0: i32) -> (i32, i32) {
    %c0_i32 = arith.constant 0 : i32
    %c0_i32_0 = arith.constant 0 : i32
    %c0_i32_1 = arith.constant 0 : i32
    return %c0_i32, %c0_i32_0 : i32, i32
  }
  func.func @transform_2(%arg0: i32) -> (i32, i32) {
    %c0_i32 = arith.constant 0 : i32
    %c0_i32_0 = arith.constant 0 : i32
    %c0_i32_1 = arith.constant 0 : i32
    return %c0_i32, %c0_i32_0 : i32, i32
  }
  func.func @transform_3(%arg0: i32) -> (i32, i32) {
    %c0_i32 = arith.constant 0 : i32
    %c0_i32_0 = arith.constant 0 : i32
    return %arg0, %c0_i32 : i32, i32
  }
}

module attributes {stable_mosaic.version = 11 : i64} {
  func.func @attention_keymask_kernel(%arg0: i32, %arg1: memref<1x8x32xf32, #tpu.memory_space<vmem>>, %arg2: memref<1x8x32xf32, #tpu.memory_space<vmem>>, %arg3: memref<1x8x32xf32, #tpu.memory_space<vmem>>, %arg4: memref<1x1x8xi32, #tpu.memory_space<vmem>>, %arg5: memref<1x8x32xf32, #tpu.memory_space<vmem>>) attributes {dimension_semantics = [#tpu.dimension_semantics<parallel>], iteration_bounds = array<i64: 2>, scalar_prefetch = 0 : i64, scratch_operands = 0 : i64, tpu.core_type = #tpu.core_type<tc>, window_params = [{transform_indices = @transform_0, window_bounds = array<i64: 1, 8, 32>}, {transform_indices = @transform_1, window_bounds = array<i64: 1, 8, 32>}, {transform_indices = @transform_2, window_bounds = array<i64: 1, 8, 32>}, {transform_indices = @transform_3, window_bounds = array<i64: 1, 1, 8>}, {transform_indices = @transform_4, window_bounds = array<i64: 1, 8, 32>}]} {
    %c0 = arith.constant 0 : index
    %c0_0 = arith.constant 0 : index
    %c0_1 = arith.constant 0 : index
    %0 = vector.load %arg4[%c0, %c0_0, %c0_1] : memref<1x1x8xi32, #tpu.memory_space<vmem>>, vector<1x1x8xi32>
    %1 = vector.shape_cast %0 : vector<1x1x8xi32> to vector<1x8xi32>
    %c0_i32 = arith.constant 0 : i32
    %2 = vector.broadcast %c0_i32 : i32 to vector<1x8xi32>
    %3 = arith.cmpi ne, %1, %2 : vector<1x8xi32>
    %c0_2 = arith.constant 0 : index
    %c0_3 = arith.constant 0 : index
    %c0_4 = arith.constant 0 : index
    %4 = vector.load %arg1[%c0_2, %c0_3, %c0_4] : memref<1x8x32xf32, #tpu.memory_space<vmem>>, vector<1x8x32xf32>
    %5 = vector.shape_cast %4 : vector<1x8x32xf32> to vector<8x32xf32>
    %c0_5 = arith.constant 0 : index
    %c0_6 = arith.constant 0 : index
    %c0_7 = arith.constant 0 : index
    %6 = vector.load %arg2[%c0_5, %c0_6, %c0_7] : memref<1x8x32xf32, #tpu.memory_space<vmem>>, vector<1x8x32xf32>
    %7 = vector.shape_cast %6 : vector<1x8x32xf32> to vector<8x32xf32>
    %c0_8 = arith.constant 0 : index
    %c0_9 = arith.constant 0 : index
    %c0_10 = arith.constant 0 : index
    %8 = vector.load %arg3[%c0_8, %c0_9, %c0_10] : memref<1x8x32xf32, #tpu.memory_space<vmem>>, vector<1x8x32xf32>
    %9 = vector.shape_cast %8 : vector<1x8x32xf32> to vector<8x32xf32>
    %10 = vector.shape_cast %5 : vector<8x32xf32> to vector<8x4x8xf32>
    %11 = tpu.transpose %10, [1, 0, 2] : vector<8x4x8xf32> -> vector<4x8x8xf32>
    %12 = vector.shape_cast %7 : vector<8x32xf32> to vector<8x4x8xf32>
    %13 = tpu.transpose %12, [1, 0, 2] : vector<8x4x8xf32> -> vector<4x8x8xf32>
    %14 = vector.shape_cast %9 : vector<8x32xf32> to vector<8x4x8xf32>
    %15 = tpu.transpose %14, [1, 0, 2] : vector<8x4x8xf32> -> vector<4x8x8xf32>
    %16 = arith.truncf %11 : vector<4x8x8xf32> to vector<4x8x8xbf16>
    %17 = arith.truncf %13 : vector<4x8x8xf32> to vector<4x8x8xbf16>
    "tpu.trace_start"() <{level = 10 : i32, message = "hqd,hkd->hqk"}> : () -> ()
    %cst = arith.constant dense<0.000000e+00> : vector<4x8x8xf32>
    %18 = tpu.matmul %16, %17, %cst {dimension_numbers = #tpu.dot_dimension_numbers<[2], [2], [1], [1], [0, 0, 0, 1, 1, 1], [0], [0]>} : vector<4x8x8xbf16>, vector<4x8x8xbf16>, vector<4x8x8xf32> -> vector<4x8x8xf32>
    %cst_11 = arith.constant -1.000000e+20 : f32
    "tpu.trace_stop"() : () -> ()
    %19 = vector.shape_cast %3 : vector<1x8xi1> to vector<1x1x8xi1>
    %20 = vector.broadcast %19 : vector<1x1x8xi1> to vector<4x8x8xi1>
    %21 = vector.broadcast %cst_11 : f32 to vector<4x8x8xf32>
    %22 = arith.select %20, %18, %21 : vector<4x8x8xi1>, vector<4x8x8xf32>
    %cst_12 = arith.constant 0.176776692 : f32
    %23 = vector.broadcast %cst_12 : f32 to vector<4x8x8xf32>
    %24 = arith.mulf %22, %23 : vector<4x8x8xf32>
    %cst_13 = arith.constant dense<0xFF800000> : vector<4x8xf32>
    %25 = vector.multi_reduction <maximumf>, %24, %cst_13 [2] : vector<4x8x8xf32> to vector<4x8xf32>
    %26 = vector.shape_cast %25 : vector<4x8xf32> to vector<4x8x1xf32>
    %27 = vector.broadcast %26 : vector<4x8x1xf32> to vector<4x8x8xf32>
    %28 = arith.subf %24, %27 : vector<4x8x8xf32>
    %29 = math.exp %28 : vector<4x8x8xf32>
    %cst_14 = arith.constant dense<0.000000e+00> : vector<4x8xf32>
    %30 = vector.multi_reduction <add>, %29, %cst_14 [2] : vector<4x8x8xf32> to vector<4x8xf32>
    %31 = vector.shape_cast %30 : vector<4x8xf32> to vector<4x8x1xf32>
    %32 = tpu.reciprocal %31 {approx = true} : vector<4x8x1xf32> -> vector<4x8x1xf32>
    %33 = vector.broadcast %32 : vector<4x8x1xf32> to vector<4x8x8xf32>
    %34 = arith.mulf %29, %33 : vector<4x8x8xf32>
    %35 = arith.truncf %34 : vector<4x8x8xf32> to vector<4x8x8xbf16>
    %36 = arith.truncf %15 : vector<4x8x8xf32> to vector<4x8x8xbf16>
    "tpu.trace_start"() <{level = 10 : i32, message = "hqk,hkd->hqd"}> : () -> ()
    %cst_15 = arith.constant dense<0.000000e+00> : vector<4x8x8xf32>
    %37 = tpu.matmul %35, %36, %cst_15 {dimension_numbers = #tpu.dot_dimension_numbers<[2], [1], [1], [2], [0, 0, 0, 1, 1, 2], [0], [0]>} : vector<4x8x8xbf16>, vector<4x8x8xbf16>, vector<4x8x8xf32> -> vector<4x8x8xf32>
    "tpu.trace_stop"() : () -> ()
    %38 = tpu.transpose %37, [1, 0, 2] : vector<4x8x8xf32> -> vector<8x4x8xf32>
    %39 = vector.shape_cast %38 : vector<8x4x8xf32> to vector<8x32xf32>
    %c0_16 = arith.constant 0 : index
    %c0_17 = arith.constant 0 : index
    %c0_18 = arith.constant 0 : index
    %40 = vector.load %arg5[%c0_16, %c0_17, %c0_18] : memref<1x8x32xf32, #tpu.memory_space<vmem>>, vector<1x8x32xf32>
    %41 = vector.shape_cast %40 : vector<1x8x32xf32> to vector<8x32xf32>
    %42 = vector.shape_cast %39 : vector<8x32xf32> to vector<1x8x32xf32>
    tpu.vector_store %arg5[%c0_16, %c0_17, %c0_18], %42 {strides = array<i32>} : memref<1x8x32xf32, #tpu.memory_space<vmem>>, vector<1x8x32xf32>,
    return
  }
  func.func @transform_0(%arg0: i32) -> (i32, i32, i32) {
    %c0_i32 = arith.constant 0 : i32
    %c0_i32_0 = arith.constant 0 : i32
    %c0_i32_1 = arith.constant 0 : i32
    return %arg0, %c0_i32, %c0_i32_0 : i32, i32, i32
  }
  func.func @transform_1(%arg0: i32) -> (i32, i32, i32) {
    %c0_i32 = arith.constant 0 : i32
    %c0_i32_0 = arith.constant 0 : i32
    %c0_i32_1 = arith.constant 0 : i32
    return %arg0, %c0_i32, %c0_i32_0 : i32, i32, i32
  }
  func.func @transform_2(%arg0: i32) -> (i32, i32, i32) {
    %c0_i32 = arith.constant 0 : i32
    %c0_i32_0 = arith.constant 0 : i32
    %c0_i32_1 = arith.constant 0 : i32
    return %arg0, %c0_i32, %c0_i32_0 : i32, i32, i32
  }
  func.func @transform_3(%arg0: i32) -> (i32, i32, i32) {
    %c0_i32 = arith.constant 0 : i32
    %c0_i32_0 = arith.constant 0 : i32
    %c0_i32_1 = arith.constant 0 : i32
    return %arg0, %c0_i32, %c0_i32_0 : i32, i32, i32
  }
  func.func @transform_4(%arg0: i32) -> (i32, i32, i32) {
    %c0_i32 = arith.constant 0 : i32
    %c0_i32_0 = arith.constant 0 : i32
    %c0_i32_1 = arith.constant 0 : i32
    return %arg0, %c0_i32, %c0_i32_0 : i32, i32, i32
  }
}

module attributes {stable_mosaic.version = 11 : i64} {
  func.func @ffn_add_ln_kernel(%arg0: i32, %arg1: memref<16x32xf32, #tpu.memory_space<vmem>>, %arg2: memref<32x64xbf16, #tpu.memory_space<vmem>>, %arg3: memref<1x64xf32, #tpu.memory_space<vmem>>, %arg4: memref<64x32xbf16, #tpu.memory_space<vmem>>, %arg5: memref<1x32xf32, #tpu.memory_space<vmem>>, %arg6: memref<1x32xf32, #tpu.memory_space<vmem>>, %arg7: memref<1x32xf32, #tpu.memory_space<vmem>>, %arg8: memref<16x32xf32, #tpu.memory_space<vmem>>) attributes {dimension_semantics = [#tpu.dimension_semantics<parallel>], iteration_bounds = array<i64: 1>, scalar_prefetch = 0 : i64, scratch_operands = 0 : i64, tpu.core_type = #tpu.core_type<tc>, window_params = [{transform_indices = @transform_0, window_bounds = array<i64: 16, 32>}, {pipeline_mode = #tpu.pipeline_mode<synchronous>, transform_indices = @transform_1, window_bounds = array<i64: 32, 64>}, {pipeline_mode = #tpu.pipeline_mode<synchronous>, transform_indices = @transform_2, window_bounds = array<i64: 1, 64>}, {pipeline_mode = #tpu.pipeline_mode<synchronous>, transform_indices = @transform_3, window_bounds = array<i64: 64, 32>}, {pipeline_mode = #tpu.pipeline_mode<synchronous>, transform_indices = @transform_4, window_bounds = array<i64: 1, 32>}, {pipeline_mode = #tpu.pipeline_mode<synchronous>, transform_indices = @transform_5, window_bounds = array<i64: 1, 32>}, {pipeline_mode = #tpu.pipeline_mode<synchronous>, transform_indices = @transform_6, window_bounds = array<i64: 1, 32>}, {transform_indices = @transform_7, window_bounds = array<i64: 16, 32>}]} {
    %c0 = arith.constant 0 : index
    %c0_0 = arith.constant 0 : index
    %0 = vector.load %arg1[%c0, %c0_0] : memref<16x32xf32, #tpu.memory_space<vmem>>, vector<16x32xf32>
    %1 = arith.truncf %0 : vector<16x32xf32> to vector<16x32xbf16>
    %c0_1 = arith.constant 0 : index
    %c0_2 = arith.constant 0 : index
    %2 = vector.load %arg2[%c0_1, %c0_2] : memref<32x64xbf16, #tpu.memory_space<vmem>>, vector<32x64xbf16>
    %cst = arith.constant dense<0.000000e+00> : vector<16x64xf32>
    %3 = tpu.matmul %1, %2, %cst {dimension_numbers = #tpu.dot_dimension_numbers<[1], [0], [0], [1], [0, 0, 1, 1], [], []>} : vector<16x32xbf16>, vector<32x64xbf16>, vector<16x64xf32> -> vector<16x64xf32>
    %c0_3 = arith.constant 0 : index
    %c0_4 = arith.constant 0 : index
    %4 = vector.load %arg3[%c0_3, %c0_4] : memref<1x64xf32, #tpu.memory_space<vmem>>, vector<1x64xf32>
    %5 = vector.broadcast %4 : vector<1x64xf32> to vector<16x64xf32>
    %6 = arith.addf %3, %5 : vector<16x64xf32>
    %cst_5 = arith.constant 0.000000e+00 : f32
    %7 = vector.broadcast %cst_5 : f32 to vector<16x64xf32>
    %8 = arith.maximumf %6, %7 : vector<16x64xf32>
    %9 = arith.truncf %8 : vector<16x64xf32> to vector<16x64xbf16>
    %c0_6 = arith.constant 0 : index
    %c0_7 = arith.constant 0 : index
    %10 = vector.load %arg4[%c0_6, %c0_7] : memref<64x32xbf16, #tpu.memory_space<vmem>>, vector<64x32xbf16>
    %cst_8 = arith.constant dense<0.000000e+00> : vector<16x32xf32>
    %11 = tpu.matmul %9, %10, %cst_8 {dimension_numbers = #tpu.dot_dimension_numbers<[1], [0], [0], [1], [0, 0, 1, 1], [], []>} : vector<16x64xbf16>, vector<64x32xbf16>, vector<16x32xf32> -> vector<16x32xf32>
    %c0_9 = arith.constant 0 : index
    %c0_10 = arith.constant 0 : index
    %12 = vector.load %arg5[%c0_9, %c0_10] : memref<1x32xf32, #tpu.memory_space<vmem>>, vector<1x32xf32>
    %13 = vector.broadcast %12 : vector<1x32xf32> to vector<16x32xf32>
    %14 = arith.addf %11, %13 : vector<16x32xf32>
    %15 = arith.addf %14, %0 : vector<16x32xf32>
    %c0_11 = arith.constant 0 : index
    %c0_12 = arith.constant 0 : index
    %16 = vector.load %arg6[%c0_11, %c0_12] : memref<1x32xf32, #tpu.memory_space<vmem>>, vector<1x32xf32>
    %c0_13 = arith.constant 0 : index
    %c0_14 = arith.constant 0 : index
    %17 = vector.load %arg7[%c0_13, %c0_14] : memref<1x32xf32, #tpu.memory_space<vmem>>, vector<1x32xf32>
    %cst_15 = arith.constant dense<0.000000e+00> : vector<16xf32>
    %18 = vector.multi_reduction <add>, %15, %cst_15 [1] : vector<16x32xf32> to vector<16xf32>
    %19 = vector.shape_cast %18 : vector<16xf32> to vector<16x1xf32>
    %cst_16 = arith.constant 3.200000e+01 : f32
    %20 = vector.broadcast %cst_16 : f32 to vector<16x1xf32>
    %21 = arith.divf %19, %20 : vector<16x1xf32>
    %22 = vector.broadcast %21 : vector<16x1xf32> to vector<16x32xf32>
    %23 = arith.subf %15, %22 : vector<16x32xf32>
    %24 = arith.mulf %23, %23 : vector<16x32xf32>
    %cst_17 = arith.constant dense<0.000000e+00> : vector<16xf32>
    %25 = vector.multi_reduction <add>, %24, %cst_17 [1] : vector<16x32xf32> to vector<16xf32>
    %26 = vector.shape_cast %25 : vector<16xf32> to vector<16x1xf32>
    %cst_18 = arith.constant 3.200000e+01 : f32
    %27 = vector.broadcast %cst_18 : f32 to vector<16x1xf32>
    %28 = arith.divf %26, %27 : vector<16x1xf32>
    %29 = vector.broadcast %21 : vector<16x1xf32> to vector<16x32xf32>
    %30 = arith.subf %15, %29 : vector<16x32xf32>
    %cst_19 = arith.constant 9.99999974E-6 : f32
    %31 = vector.broadcast %cst_19 : f32 to vector<16x1xf32>
    %32 = arith.addf %28, %31 : vector<16x1xf32>
    %33 = math.rsqrt %32 : vector<16x1xf32>
    %34 = vector.broadcast %33 : vector<16x1xf32> to vector<16x32xf32>
    %35 = arith.mulf %30, %34 : vector<16x32xf32>
    %36 = vector.broadcast %16 : vector<1x32xf32> to vector<16x32xf32>
    %37 = arith.mulf %35, %36 : vector<16x32xf32>
    %38 = vector.broadcast %17 : vector<1x32xf32> to vector<16x32xf32>
    %39 = arith.addf %37, %38 : vector<16x32xf32>
    %c0_20 = arith.constant 0 : index
    %c0_21 = arith.constant 0 : index
    %40 = vector.load %arg8[%c0_20, %c0_21] : memref<16x32xf32, #tpu.memory_space<vmem>>, vector<16x32xf32>
    tpu.vector_store %arg8[%c0_20, %c0_21], %39 {strides = array<i32>} : memref<16x32xf32, #tpu.memory_space<vmem>>, vector<16x32xf32>,
    return
  }
  func.func @transform_0(%arg0: i32) -> (i32, i32) {
    %c0_i32 = arith.constant 0 : i32
    %c0_i32_0 = arith.constant 0 : i32
    return %arg0, %c0_i32 : i32, i32
  }
  func.func @transform_1(%arg0: i32) -> (i32, i32) {
    %c0_i32 = arith.constant 0 : i32
    %c0_i32_0 = arith.constant 0 : i32
    %c0_i32_1 = arith.constant 0 : i32
    return %c0_i32, %c0_i32_0 : i32, i32
  }
  func.func @transform_2(%arg0: i32) -> (i32, i32) {
    %c0_i32 = arith.constant 0 : i32
    %c0_i32_0 = arith.constant 0 : i32
    %c0_i32_1 = arith.constant 0 : i32
    return %c0_i32, %c0_i32_0 : i32, i32
  }
  func.func @transform_3(%arg0: i32) -> (i32, i32) {
    %c0_i32 = arith.constant 0 : i32
    %c0_i32_0 = arith.constant 0 : i32
    %c0_i32_1 = arith.constant 0 : i32
    return %c0_i32, %c0_i32_0 : i32, i32
  }
  func.func @transform_4(%arg0: i32) -> (i32, i32) {
    %c0_i32 = arith.constant 0 : i32
    %c0_i32_0 = arith.constant 0 : i32
    %c0_i32_1 = arith.constant 0 : i32
    return %c0_i32, %c0_i32_0 : i32, i32
  }
  func.func @transform_5(%arg0: i32) -> (i32, i32) {
    %c0_i32 = arith.constant 0 : i32
    %c0_i32_0 = arith.constant 0 : i32
    %c0_i32_1 = arith.constant 0 : i32
    return %c0_i32, %c0_i32_0 : i32, i32
  }
  func.func @transform_6(%arg0: i32) -> (i32, i32) {
    %c0_i32 = arith.constant 0 : i32
    %c0_i32_0 = arith.constant 0 : i32
    %c0_i32_1 = arith.constant 0 : i32
    return %c0_i32, %c0_i32_0 : i32, i32
  }
  func.func @transform_7(%arg0: i32) -> (i32, i32) {
    %c0_i32 = arith.constant 0 : i32
    %c0_i32_0 = arith.constant 0 : i32
    return %arg0, %c0_i32 : i32, i32
  }
}

module attributes {stable_mosaic.version = 11 : i64} {
  func.func @linear_kernel(%arg0: i32, %arg1: memref<16x32xf32, #tpu.memory_space<vmem>>, %arg2: memref<32x64xbf16, #tpu.memory_space<vmem>>, %arg3: memref<1x64xf32, #tpu.memory_space<vmem>>, %arg4: memref<16x64xf32, #tpu.memory_space<vmem>>) attributes {dimension_semantics = [#tpu.dimension_semantics<parallel>], iteration_bounds = array<i64: 1>, scalar_prefetch = 0 : i64, scratch_operands = 0 : i64, tpu.core_type = #tpu.core_type<tc>, window_params = [{transform_indices = @transform_0, window_bounds = array<i64: 16, 32>}, {pipeline_mode = #tpu.pipeline_mode<synchronous>, transform_indices = @transform_1, window_bounds = array<i64: 32, 64>}, {pipeline_mode = #tpu.pipeline_mode<synchronous>, transform_indices = @transform_2, window_bounds = array<i64: 1, 64>}, {transform_indices = @transform_3, window_bounds = array<i64: 16, 64>}]} {
    %c0 = arith.constant 0 : index
    %c0_0 = arith.constant 0 : index
    %0 = vector.load %arg1[%c0, %c0_0] : memref<16x32xf32, #tpu.memory_space<vmem>>, vector<16x32xf32>
    %1 = arith.truncf %0 : vector<16x32xf32> to vector<16x32xbf16>
    %c0_1 = arith.constant 0 : index
    %c0_2 = arith.constant 0 : index
    %2 = vector.load %arg2[%c0_1, %c0_2] : memref<32x64xbf16, #tpu.memory_space<vmem>>, vector<32x64xbf16>
    %cst = arith.constant dense<0.000000e+00> : vector<16x64xf32>
    %3 = tpu.matmul %1, %2, %cst {dimension_numbers = #tpu.dot_dimension_numbers<[1], [0], [0], [1], [0, 0, 1, 1], [], []>} : vector<16x32xbf16>, vector<32x64xbf16>, vector<16x64xf32> -> vector<16x64xf32>
    %c0_3 = arith.constant 0 : index
    %c0_4 = arith.constant 0 : index
    %4 = vector.load %arg3[%c0_3, %c0_4] : memref<1x64xf32, #tpu.memory_space<vmem>>, vector<1x64xf32>
    %5 = vector.broadcast %4 : vector<1x64xf32> to vector<16x64xf32>
    %6 = arith.addf %3, %5 : vector<16x64xf32>
    %c0_5 = arith.constant 0 : index
    %c0_6 = arith.constant 0 : index
    %7 = vector.load %arg4[%c0_5, %c0_6] : memref<16x64xf32, #tpu.memory_space<vmem>>, vector<16x64xf32>
    tpu.vector_store %arg4[%c0_5, %c0_6], %6 {strides = array<i32>} : memref<16x64xf32, #tpu.memory_space<vmem>>, vector<16x64xf32>,
    return
  }
  func.func @transform_0(%arg0: i32) -> (i32, i32) {
    %c0_i32 = arith.constant 0 : i32
    %c0_i32_0 = arith.constant 0 : i32
    return %arg0, %c0_i32 : i32, i32
  }
  func.func @transform_1(%arg0: i32) -> (i32, i32) {
    %c0_i32 = arith.constant 0 : i32
    %c0_i32_0 = arith.constant 0 : i32
    %c0_i32_1 = arith.constant 0 : i32
    return %c0_i32, %c0_i32_0 : i32, i32
  }
  func.func @transform_2(%arg0: i32) -> (i32, i32) {
    %c0_i32 = arith.constant 0 : i32
    %c0_i32_0 = arith.constant 0 : i32
    %c0_i32_1 = arith.constant 0 : i32
    return %c0_i32, %c0_i32_0 : i32, i32
  }
  func.func @transform_3(%arg0: i32) -> (i32, i32) {
    %c0_i32 = arith.constant 0 : i32
    %c0_i32_0 = arith.constant 0 : i32
    return %arg0, %c0_i32 : i32, i32
  }
}

module attributes {stable_mosaic.version = 11 : i64} {
  func.func @linear_kernel(%arg0: i32, %arg1: memref<16x32xf32, #tpu.memory_space<vmem>>, %arg2: memref<32x18xbf16, #tpu.memory_space<vmem>>, %arg3: memref<1x18xf32, #tpu.memory_space<vmem>>, %arg4: memref<16x18xf32, #tpu.memory_space<vmem>>) attributes {dimension_semantics = [#tpu.dimension_semantics<parallel>], iteration_bounds = array<i64: 1>, scalar_prefetch = 0 : i64, scratch_operands = 0 : i64, tpu.core_type = #tpu.core_type<tc>, window_params = [{transform_indices = @transform_0, window_bounds = array<i64: 16, 32>}, {pipeline_mode = #tpu.pipeline_mode<synchronous>, transform_indices = @transform_1, window_bounds = array<i64: 32, 18>}, {pipeline_mode = #tpu.pipeline_mode<synchronous>, transform_indices = @transform_2, window_bounds = array<i64: 1, 18>}, {transform_indices = @transform_3, window_bounds = array<i64: 16, 18>}]} {
    %c0 = arith.constant 0 : index
    %c0_0 = arith.constant 0 : index
    %0 = vector.load %arg1[%c0, %c0_0] : memref<16x32xf32, #tpu.memory_space<vmem>>, vector<16x32xf32>
    %1 = arith.truncf %0 : vector<16x32xf32> to vector<16x32xbf16>
    %c0_1 = arith.constant 0 : index
    %c0_2 = arith.constant 0 : index
    %2 = vector.load %arg2[%c0_1, %c0_2] : memref<32x18xbf16, #tpu.memory_space<vmem>>, vector<32x18xbf16>
    %cst = arith.constant dense<0.000000e+00> : vector<16x18xf32>
    %3 = tpu.matmul %1, %2, %cst {dimension_numbers = #tpu.dot_dimension_numbers<[1], [0], [0], [1], [0, 0, 1, 1], [], []>} : vector<16x32xbf16>, vector<32x18xbf16>, vector<16x18xf32> -> vector<16x18xf32>
    %c0_3 = arith.constant 0 : index
    %c0_4 = arith.constant 0 : index
    %4 = vector.load %arg3[%c0_3, %c0_4] : memref<1x18xf32, #tpu.memory_space<vmem>>, vector<1x18xf32>
    %5 = vector.broadcast %4 : vector<1x18xf32> to vector<16x18xf32>
    %6 = arith.addf %3, %5 : vector<16x18xf32>
    %c0_5 = arith.constant 0 : index
    %c0_6 = arith.constant 0 : index
    %7 = vector.load %arg4[%c0_5, %c0_6] : memref<16x18xf32, #tpu.memory_space<vmem>>, vector<16x18xf32>
    tpu.vector_store %arg4[%c0_5, %c0_6], %6 {strides = array<i32>} : memref<16x18xf32, #tpu.memory_space<vmem>>, vector<16x18xf32>,
    return
  }
  func.func @transform_0(%arg0: i32) -> (i32, i32) {
    %c0_i32 = arith.constant 0 : i32
    %c0_i32_0 = arith.constant 0 : i32
    return %arg0, %c0_i32 : i32, i32
  }
  func.func @transform_1(%arg0: i32) -> (i32, i32) {
    %c0_i32 = arith.constant 0 : i32
    %c0_i32_0 = arith.constant 0 : i32
    %c0_i32_1 = arith.constant 0 : i32
    return %c0_i32, %c0_i32_0 : i32, i32
  }
  func.func @transform_2(%arg0: i32) -> (i32, i32) {
    %c0_i32 = arith.constant 0 : i32
    %c0_i32_0 = arith.constant 0 : i32
    %c0_i32_1 = arith.constant 0 : i32
    return %c0_i32, %c0_i32_0 : i32, i32
  }
  func.func @transform_3(%arg0: i32) -> (i32, i32) {
    %c0_i32 = arith.constant 0 : i32
    %c0_i32_0 = arith.constant 0 : i32
    return %arg0, %c0_i32 : i32, i32
  }
}

</mosaic_0001>

<bundles_post_ra>
// kernel: transformer_forward.36
= control target key start
LH: loop header
LB: loop body
LE: loop exit
PB: predicated region body
PF: predicated region fallthrough
CT: control target
= control target key end

     0   :  { %v111_v0 = vmov 0.0   ;;  %vm112_vm0 = vmmov 0   ;;  %vm41_vm1 = vcmask 261120   ;;  %s154_s1 = inlined_call_operand.vmem [shape: bf16[32,32], index: 1, kind: input, shape index: {}]   ;;  %s155_s0 = inlined_call_operand.vmem [shape: f32[16,32], index: 0, kind: input, shape index: {}]   ;;  %s156_s2 = inlined_call_operand.vmem [shape: f32[1,32], index: 2, kind: input, shape index: {}]   ;;  %s157_s3 = inlined_call_operand.vmem [shape: f32[16,32], index: 3, kind: output, shape index: {}]  }
   0x1   :  { %99 = vmatprep.subr.bf16.mxu0 %v111_v0  ;;  %v109_v1 = vld [vmem:[%s154_s1] sm:$0xff]   ;;  %103 = vmatprep.mubr.msk.bf16.mxu0 %vm112_vm0, %v111_v0  ;;  %v110_v2 = vld [vmem:[%s154_s1 + $0x8] sm:$0xff]  }
   0x2   :  { %100 = vmatpush3.bf16.msra.mxu0 %v109_v1  ;;  %v15_v3 = vld [vmem:[%s155_s0] sm:$0xff]  ;;  %v16_v4 = vld [vmem:[%s155_s0 + $0x8] sm:$0xff] }
   0x3   :  { %101 = vmatprep.subr.bf16.mxu0 %v111_v0  ;;  %v17_v5 = vpack.c.bf16 %v16_v4, %v15_v3  ;;  %v92_v6 = vld [vmem:[%s156_s2] ss:$0 sm:$0xff] }
   0x6   :  { %102 = vmatpush3.bf16.msra.mxu0 %v110_v2 }
   0x9   :  { %104 = vmatmul.mubr.msk.bf16.vlgmr.msra.gmra.mrb[0].mxu0 %vm41_vm1, %v17_v5 }
  0xdc   :  { %v79_v7 = vpop.f32.mrb[0].mxu0 }
  0xdd   :  { %v80_v8 = vadd.f32 %v92_v6, %v79_v7  ;;  %v105_v9 = vpop.f32.mrb[1].mxu0 }
  0xde   :  { %v82_v10 = vpop.f32.mrb[2].mxu0 }
  0xdf   :  { %86 = vst.msk [vmem:[%s157_s3] sm:$0xff] %vm41_vm1, %v80_v8  ;;  %v83_v11 = vadd.f32 %v92_v6, %v82_v10  ;;  %v106_v12 = vpop.f32.mrb[3].mxu0 }
  0xe1   :  { %87 = vst.msk [vmem:[%s157_s3 + $0x8] sm:$0xff] %vm41_vm1, %v83_v11 }

// kernel: transformer_forward.33
= control target key start
LH: loop header
LB: loop body
LE: loop exit
PB: predicated region body
PF: predicated region fallthrough
CT: control target
= control target key end

     0   :  { %v112_v0 = vmov 0.0   ;;  %vm113_vm0 = vmmov 0   ;;  %vm41_vm1 = vcmask 261120   ;;  %vm86_vm2 = vcmask 785408   ;;  %s155_s1 = inlined_call_operand.vmem [shape: bf16[32,96], index: 1, kind: input, shape index: {}]   ;;  %s156_s0 = inlined_call_operand.vmem [shape: f32[16,32], index: 0, kind: input, shape index: {}]   ;;  %s157_s2 = inlined_call_operand.vmem [shape: f32[1,96], index: 2, kind: input, shape index: {}]   ;;  %s158_s3 = inlined_call_operand.vmem [shape: f32[16,96], index: 3, kind: output, shape index: {}]  }
   0x1   :  { %100 = vmatprep.subr.bf16.mxu0 %v112_v0  ;;  %v110_v1 = vld [vmem:[%s155_s1] sm:$0xff]   ;;  %104 = vmatprep.mubr.msk.bf16.mxu0 %vm113_vm0, %v112_v0  ;;  %v111_v2 = vld [vmem:[%s155_s1 + $0x8] sm:$0xff]  }
   0x2   :  { %101 = vmatpush3.bf16.msra.mxu0 %v110_v1  ;;  %v15_v3 = vld [vmem:[%s156_s0] sm:$0xff]  ;;  %v16_v4 = vld [vmem:[%s156_s0 + $0x8] sm:$0xff] }
   0x3   :  { %102 = vmatprep.subr.bf16.mxu0 %v112_v0  ;;  %v17_v5 = vpack.c.bf16 %v16_v4, %v15_v3  ;;  %v93_v6 = vld [vmem:[%s157_s2] ss:$0 sm:$0xff] }
   0x6   :  { %103 = vmatpush3.bf16.msra.mxu0 %v111_v2 }
   0x9   :  { %105 = vmatmul.mubr.msk.bf16.vlgmr.msra.gmra.mrb[0].mxu0 %vm41_vm1, %v17_v5 }
  0xdc   :  { %v79_v7 = vpop.f32.mrb[0].mxu0 }
  0xdd   :  { %v80_v8 = vadd.f32 %v93_v6, %v79_v7  ;;  %v106_v9 = vpop.f32.mrb[1].mxu0 }
  0xde   :  { %v82_v10 = vpop.f32.mrb[2].mxu0 }
  0xdf   :  { %87 = vst.msk [vmem:[%s158_s3] sm:$0xff] %vm86_vm2, %v80_v8  ;;  %v83_v11 = vadd.f32 %v93_v6, %v82_v10  ;;  %v107_v12 = vpop.f32.mrb[3].mxu0 }
  0xe1   :  { %88 = vst.msk [vmem:[%s158_s3 + $0x8] sm:$0xff] %vm86_vm2, %v83_v11 }

// kernel: transformer_forward.35
= control target key start
LH: loop header
LB: loop body
LE: loop exit
PB: predicated region body
PF: predicated region fallthrough
CT: control target
= control target key end

     0   :  { %v175_v0 = vmov 0.0   ;;  %vm176_vm0 = vmmov 0   ;;  %vm50_vm1 = vcmask 261120   ;;  %s252_s1 = inlined_call_operand.vmem [shape: bf16[32,32], index: 1, kind: input, shape index: {}]   ;;  %s253_s0 = inlined_call_operand.vmem [shape: f32[16,32], index: 0, kind: input, shape index: {}]   ;;  %s254_s2 = inlined_call_operand.vmem [shape: f32[1,32], index: 2, kind: input, shape index: {}]   ;;  %s255_s3 = inlined_call_operand.vmem [shape: f32[16,32], index: 3, kind: input, shape index: {}]   ;;  %s256_s4 = inlined_call_operand.vmem [shape: f32[1,32], index: 4, kind: input, shape index: {}]   ;;  %s257_s5 = inlined_call_operand.vmem [shape: f32[1,32], index: 5, kind: input, shape index: {}]   ;;  %s258_s6 = inlined_call_operand.vmem [shape: f32[16,32], index: 6, kind: output, shape index: {}]  }
   0x1   :  { %159 = vmatprep.subr.bf16.mxu0 %v175_v0  ;;  %v169_v1 = vld [vmem:[%s252_s1] sm:$0xff]   ;;  %163 = vmatprep.mubr.msk.bf16.mxu0 %vm176_vm0, %v175_v0  ;;  %v170_v2 = vld [vmem:[%s252_s1 + $0x8] sm:$0xff]  }
   0x2   :  { %160 = vmatpush3.bf16.msra.mxu0 %v169_v1  ;;  %v24_v3 = vld [vmem:[%s253_s0] sm:$0xff]  ;;  %v25_v4 = vld [vmem:[%s253_s0 + $0x8] sm:$0xff] }
   0x3   :  { %161 = vmatprep.subr.bf16.mxu0 %v175_v0  ;;  %v26_v5 = vpack.c.bf16 %v25_v4, %v24_v3  ;;  %v150_v6 = vld [vmem:[%s254_s2] ss:$0 sm:$0xff]  ;;  %v96_v12 = vld [vmem:[%s255_s3 + $0x8] sm:$0xff] }
   0x4   :  { %v95_v8 = vld [vmem:[%s255_s3] sm:$0xff] }
   0x5   :  { %v154_v36 = vld [vmem:[%s256_s4] ss:$0 sm:$0xff] }
   0x6   :  { %162 = vmatpush3.bf16.msra.mxu0 %v170_v2  ;;  %v155_v38 = vld [vmem:[%s257_s5] ss:$0 sm:$0xff] }
   0x9   :  { %164 = vmatmul.mubr.msk.bf16.vlgmr.msra.gmra.mrb[0].mxu0 %vm50_vm1, %v26_v5 }
  0xdc   :  { %v88_v7 = vpop.f32.mrb[0].mxu0 }
  0xdd   :  { %v89_v9 = vadd.f32 %v150_v6, %v88_v7  ;;  %v165_v10 = vpop.f32.mrb[1].mxu0 }
  0xde   :  { %v91_v11 = vpop.f32.mrb[2].mxu0 }
  0xdf   :  { %v92_v13 = vadd.f32 %v150_v6, %v91_v11  ;;  %v166_v14 = vpop.f32.mrb[3].mxu0  ;;  %v97_v15 = vadd.f32 %v95_v8, %v89_v9 }
  0xe1   :  { %v101_v16 = vsel %vm50_vm1, %v97_v15, 0.0  ;;  %v98_v17 = vadd.f32 %v96_v12, %v92_v13 }
  0xe2   :  { %102 = vadd.xlane.f32.xlu0 %v101_v16 }
  0xe3   :  { %v104_v18 = vsel %vm50_vm1, %v98_v17, 0.0 }
  0xe6   :  { %105 = vadd.xlane.f32.xlu0 %v104_v18 }
 0x16f   :  { %v103_v19 = vpop.xlane.xlu0 %102 }
 0x170   :  { %v108_v20 = vmul.f32 0.03125, %v103_v19 }
 0x172   :  { %v110_v21 = vsub.f32 %v97_v15, %v108_v20 }
 0x173   :  { %v106_v22 = vpop.xlane.xlu0 %105 }
 0x174   :  { %v109_v23 = vmul.f32 0.03125, %v106_v22  ;;  %v112_v24 = vmul.f32 %v110_v21, %v110_v21 }
 0x176   :  { %v111_v25 = vsub.f32 %v98_v17, %v109_v23  ;;  %v114_v26 = vsel %vm50_vm1, %v112_v24, 0.0 }
 0x177   :  { %115 = vadd.xlane.f32.xlu1 %v114_v26 }
 0x178   :  { %v113_v27 = vmul.f32 %v111_v25, %v111_v25 }
 0x17a   :  { %v117_v28 = vsel %vm50_vm1, %v113_v27, 0.0 }
 0x17b   :  { %118 = vadd.xlane.f32.xlu1 %v117_v28 }
 0x204   :  { %v116_v29 = vpop.xlane.xlu1 %115 }
 0x205   :  { %v120_v30 = vmul.f32 0.03125, %v116_v29 }
 0x207   :  { %v122_v31 = vadd.f32 1e-05, %v120_v30 }
 0x208   :  { %v119_v32 = vpop.xlane.xlu1 %118 }
 0x209   :  { %171 = vrsqrt.f32 %v122_v31  ;;  %v121_v33 = vmul.f32 0.03125, %v119_v32 }
 0x20b   :  { %v123_v34 = vadd.f32 1e-05, %v121_v33 }
 0x20d   :  { %173 = vrsqrt.f32 %v123_v34 }
 0x213   :  { %v172_v35 = vpop.eup %171 }
 0x214   :  { %v126_v37 = vmul.f32 %v172_v35, %v110_v21 }
 0x216   :  { %v134_v39 = vmul.f32 %v154_v36, %v126_v37 }
 0x217   :  { %v174_v40 = vpop.eup %173 }
 0x218   :  { %v142_v41 = vadd.f32 %v155_v38, %v134_v39  ;;  %v127_v42 = vmul.f32 %v174_v40, %v111_v25 }
 0x21a   :  { %144 = vst.msk [vmem:[%s258_s6] sm:$0xff] %vm50_vm1, %v142_v41  ;;  %v135_v43 = vmul.f32 %v154_v36, %v127_v42 }
 0x21c   :  { %v143_v44 = vadd.f32 %v155_v38, %v135_v43 }
 0x21e   :  { %145 = vst.msk [vmem:[%s258_s6 + $0x8] sm:$0xff] %vm50_vm1, %v143_v44 }

// kernel: transformer_forward.34
= control target key start
LH: loop header
LB: loop body
LE: loop exit
PB: predicated region body
PF: predicated region fallthrough
CT: control target
= control target key end

     0   :  { %s1482_s12 = smov 0   ;;  %s1673_s0 = inlined_call_operand.vmem [shape: f32[2,8,32], index: 0, kind: input, shape index: {}]   ;;  %s1674_s1 = inlined_call_operand.vmem [shape: f32[2,8,32], index: 1, kind: input, shape index: {}]   ;;  %s1675_s2 = inlined_call_operand.vmem [shape: f32[2,8,32], index: 2, kind: input, shape index: {}]   ;;  %s1676_s3 = inlined_call_operand.vmem [shape: f32[2,8,32], index: 3, kind: output, shape index: {}]  }
   0x1 LB: > { %s1319_s13 = sadd.s32 4294967295, %s1450_s12   ;;  %p1323_p0 = scmp.ge.s32.totalorder %s1450_s12, 1  ;;  %s1450_s12 = sphi %s1482_s12, %s13_s12  }
   0x2   : > { %p154_p1 = scmp.lt.s32.totalorder %s1450_s12, 3 }
   0x4   : > { %p155_p2 = pnand %p1323_p0, %p154_p1 }
   0x5   : > { %p184_p3 = scmp.lt.s32.totalorder (!%p155_p2), %s1319_s13, 1  ;;  %s1452_s21 = smov (!%p155_p2), 104   ;;  %v1455_v2 = vmov (!%p155_p2), 0.0   ;;  %vm1456_vm0 = vmmov (!%p155_p2), 0   ;;  %v201_v3 = vlaneseq (!%p155_p2)  ;;  %v1457_v6 = vmov (!%p155_p2), 1983009808  }
   0x6   : > { %158 = sbr.rel (%p155_p2) target bundleno = 1100 (0x44c), region = 32  ;;  %s1453_s22 = smov (!%p155_p2), 120   ;;  %1362 = vmatprep.subr.bf16.mxu0 (!%p155_p2), %v1455_v2  ;;  %1368 = vmatprep.subr.bf16.mxu1 (!%p155_p2), %v1455_v2  ;;  %v222_v7 = vunpack.c.l.s4 (!%p155_p2), %v1457_v6  ;;  %v1458_v8 = vmov (!%p155_p2), 1934713408   ;;  %vm655_vm2 = vcmask (!%p155_p2), 64512   ;;  %vm905_vm3 = vcmask (!%p155_p2), 1043456  }
   0x7   : > { %s1454_s23 = smov (!%p155_p2), 112   ;;  %1364 = vmatprep.mubr.msk.bf16.mxu0 (!%p155_p2), %vm1456_vm0, %v1455_v2  ;;  %1370 = vmatprep.mubr.msk.bf16.mxu1 (!%p155_p2), %vm1456_vm0, %v1455_v2  ;;  %v1512_v4 = vshrl.u32 (!%p155_p2), %v201_v3, 7  ;;  %v1514_v5 = vand.u32 (!%p155_p2), 127, %v201_v3  ;;  %v254_v9 = vunpack.c.l.s4 (!%p155_p2), %v1458_v8  ;;  %s1459_s27 = smov (!%p155_p2), 16   ;;  %vm1236_vm4 = vcmask (!%p155_p2), 130048  }
   0x8   : > { %v223_v10 = vunpack.c.0.s8 (!%p155_p2), %v222_v7  ;;  %s1460_s28 = smov (!%p155_p2), 8   ;;  %s1461_s29 = smov (!%p155_p2), 24   ;;  %vm1238_vm5 = vcmask (!%p155_p2), 195584   ;;  %vm1240_vm6 = vcmask (!%p155_p2), 261120  }
   0x9   : > { %vm208_vm1 = vcmp.ge.s32.totalorder (!%p155_p2), %v1512_v4, %v1514_v5  ;;  %v255_v13 = vunpack.c.0.s8 (!%p155_p2), %v254_v9 }
   0xa   : > { %v1519_v14 = vsub.s32 (!%p155_p2), %v223_v10, %v1512_v4 }
   0xb   : > { %v1522_v21 = vsub.s32 (!%p155_p2), %v255_v13, %v1512_v4 }
   0xd   : > { %s1678_s13 = smov (!%p184_p3, %s1319_s13), 1 }
   0xe   : > { %s1490_s14 = sshll.u32 %s1678_s13, 3 }
   0xf   : > { %s191_s17 = scalar_lea.vmem %s1674_s1, %s1490_s14  ;;  %s187_s20 = scalar_lea.vmem %s1673_s0, %s1490_s14 }
  0x10   : > { %v206_v0 = vld [vmem:[%s191_s17] sm:$0xff]  ;;  %s195_s26 = scalar_lea.vmem %s1675_s2, %s1490_s14  ;;  %s199_s5 = scalar_lea.vmem %s1676_s3, %s1490_s14 }
  0x11   : > { %362 = vrot.lane.b32.xlu1 %v206_v0, %s1452_s21  ;;  %356 = vrot.lane.b32.xlu0 %v206_v0, %s1453_s22  ;;  %v205_v1 = vld [vmem:[%s187_s20] sm:$0xff] }
  0x12   : > { %v207_v4 = vld [vmem:[%s195_s26] sm:$0xff] }
  0x15   : > { %359 = vrot.lane.b32.xlu0 %v206_v0, %s1454_s23  ;;  %210 = vrot.lane.b32.xlu1 %v205_v1, %s1453_s22 }
  0x19   : > { %213 = vrot.lane.b32.xlu0 %v205_v1, %s1454_s23  ;;  %216 = vrot.lane.b32.xlu1 %v205_v1, %s1452_s21 }
  0x83   : > { %v363_v11 = vpop.permute.xlu1 %362  ;;  %v357_v12 = vpop.permute.xlu0 %356 }
  0x84   : > { %v381_v15 = vcombine.low %v357_v12, %v363_v11  ;;  %v382_v16 = vcombine.high %v357_v12, %v363_v11 }
  0x86   : > { %v389_v22 = vrot.slane %v381_v15, %v1519_v14  ;;  %v396_v23 = vrot.slane %v382_v16, %v1519_v14 }
  0x87   : > { %v360_v17 = vpop.permute.xlu0 %359  ;;  %v211_v18 = vpop.permute.xlu1 %210 }
  0x88   : > { %v365_v19 = vcombine.low %v206_v0, %v360_v17  ;;  %v366_v20 = vcombine.high %v206_v0, %v360_v17 }
  0x8a   : > { %v373_v24 = vrot.slane %v365_v19, %v1519_v14  ;;  %v380_v25 = vrot.slane %v366_v20, %v1519_v14 }
  0x8b   : > { %v214_v26 = vpop.permute.xlu0 %213  ;;  %v217_v27 = vpop.permute.xlu1 %216 }
  0x8c   : > { %v397_v28 = vcombine.low %v373_v24, %v389_v22  ;;  %v398_v29 = vcombine.high %v373_v24, %v389_v22  ;;  %v413_v30 = vcombine.low %v380_v25, %v396_v23  ;;  %v414_v31 = vcombine.high %v380_v25, %v396_v23 }
  0x8d   : > { %v219_v32 = vcombine.low %v205_v1, %v214_v26  ;;  %v220_v33 = vcombine.high %v205_v1, %v214_v26  ;;  %v235_v34 = vcombine.low %v211_v18, %v217_v27  ;;  %v236_v35 = vcombine.high %v211_v18, %v217_v27 }
  0x8e   : > { %v405_v36 = vrot.slane %v397_v28, %v1522_v21  ;;  %v412_v37 = vrot.slane %v398_v29, %v1522_v21  ;;  %v421_v38 = vrot.slane %v413_v30, %v1522_v21  ;;  %v428_v39 = vrot.slane %v414_v31, %v1522_v21 }
  0x8f   : > { %v227_v40 = vrot.slane %v219_v32, %v1519_v14  ;;  %v234_v41 = vrot.slane %v220_v33, %v1519_v14  ;;  %v243_v42 = vrot.slane %v235_v34, %v1519_v14  ;;  %v250_v43 = vrot.slane %v236_v35, %v1519_v14 }
  0x90   : > { %v433_v44 = vcombine.low %v405_v36, %v412_v37  ;;  %v1330_v45 = vcombine.high %v405_v36, %v412_v37  ;;  %v449_v46 = vcombine.low %v421_v38, %v428_v39  ;;  %v1331_v47 = vcombine.high %v421_v38, %v428_v39 }
  0x91   : > { %v251_v48 = vcombine.low %v227_v40, %v243_v42  ;;  %v252_v49 = vcombine.high %v227_v40, %v243_v42  ;;  %v267_v50 = vcombine.low %v234_v41, %v250_v43  ;;  %v268_v51 = vcombine.high %v234_v41, %v250_v43 }
  0x92   : > { %v440_v52 = vrot.slane %v433_v44, %v1519_v14  ;;  %v448_v53 = vrot.slane %v1330_v45, %v1519_v14  ;;  %v456_v54 = vrot.slane %v449_v46, %v1519_v14  ;;  %v464_v55 = vrot.slane %v1331_v47, %v1519_v14 }
  0x93   : > { %v259_v56 = vrot.slane %v251_v48, %v1522_v21  ;;  %v266_v57 = vrot.slane %v252_v49, %v1522_v21  ;;  %v275_v58 = vrot.slane %v267_v50, %v1522_v21  ;;  %v282_v59 = vrot.slane %v268_v51, %v1522_v21 }
  0x94   : > { %v465_v60 = vcombine.low %v440_v52, %v448_v53  ;;  %v481_v61 = vcombine.low %v456_v54, %v464_v55  ;;  %v466_v62 = vcombine.high %v440_v52, %v448_v53  ;;  %v482_v63 = vcombine.high %v456_v54, %v464_v55 }
  0x95   : > { %v287_v0 = vcombine.low %v259_v56, %v266_v57  ;;  %v1328_v1 = vcombine.high %v259_v56, %v266_v57  ;;  %v303_v3 = vcombine.low %v275_v58, %v282_v59  ;;  %v1329_v6 = vcombine.high %v275_v58, %v282_v59 }
  0x96   : > { %v473_v7 = vrot.slane %v465_v60, %v1522_v21  ;;  %v489_v8 = vrot.slane %v481_v61, %v1522_v21  ;;  %v480_v16 = vrot.slane %v466_v62, %v1522_v21  ;;  %v496_v17 = vrot.slane %v482_v63, %v1522_v21 }
  0x97   : > { %v294_v9 = vrot.slane %v287_v0, %v1519_v14  ;;  %v302_v10 = vrot.slane %v1328_v1, %v1519_v14  ;;  %v310_v11 = vrot.slane %v303_v3, %v1519_v14  ;;  %v318_v12 = vrot.slane %v1329_v6, %v1519_v14 }
  0x98   : > { %v497_v13 = vcombine.low %v473_v7, %v489_v8  ;;  %v498_v15 = vcombine.high %v473_v7, %v489_v8  ;;  %v499_v27 = vcombine.low %v480_v16, %v496_v17  ;;  %v500_v28 = vcombine.high %v480_v16, %v496_v17 }
  0x99   : > { %v319_v18 = vcombine.low %v294_v9, %v302_v10  ;;  %v335_v19 = vcombine.low %v310_v11, %v318_v12  ;;  %v320_v29 = vcombine.high %v294_v9, %v302_v10  ;;  %v336_v30 = vcombine.high %v310_v11, %v318_v12 }
  0x9a   : > { %v651_v20 = vpack.c.bf16 %v497_v13, %v497_v13  ;;  %v652_v22 = vpack.c.bf16 %v498_v15, %v498_v15  ;;  %v653_v33 = vpack.c.bf16 %v499_v27, %v499_v27  ;;  %v654_v34 = vpack.c.bf16 %v500_v28, %v500_v28 }
  0x9b   : > { %v327_v23 = vrot.slane %v319_v18, %v1522_v21  ;;  %v343_v24 = vrot.slane %v335_v19, %v1522_v21  ;;  %v334_v37 = vrot.slane %v320_v29, %v1522_v21  ;;  %v350_v38 = vrot.slane %v336_v30, %v1522_v21 }
  0x9c   : > { %v660_v25 = vsel %vm655_vm2, %v651_v20, 0  ;;  %v706_v26 = vsel %vm655_vm2, %v652_v22, 0  ;;  %v752_v39 = vsel %vm655_vm2, %v653_v33, 0  ;;  %v798_v40 = vsel %vm655_vm2, %v654_v34, 0 }
  0x9d   : > { %1363 = vmatpush3.bf16.xpose.msra.mxu0 %v660_v25  ;;  %1369 = vmatpush3.bf16.xpose.msra.mxu1 %v706_v26  ;;  %v351_v31 = vcombine.low %v327_v23, %v343_v24  ;;  %v352_v32 = vcombine.high %v327_v23, %v343_v24  ;;  %v353_v41 = vcombine.low %v334_v37, %v350_v38 }
  0x9e   : > { %1374 = vmatprep.subr.bf16.mxu0 %v1455_v2  ;;  %1380 = vmatprep.subr.bf16.mxu1 %v1455_v2  ;;  %v354_v42 = vcombine.high %v334_v37, %v350_v38 }
  0x9f   : > { %v647_v35 = vpack.c.bf16 %v351_v31, %v351_v31  ;;  %v648_v36 = vpack.c.bf16 %v352_v32, %v352_v32  ;;  %v649_v43 = vpack.c.bf16 %v353_v41, %v353_v41 }
  0xa0   : > { %v650_v44 = vpack.c.bf16 %v354_v42, %v354_v42 }
  0xa4   : > { %1365 = vmatmul.mubr.msk.bf16.vlgmr.msra.gmra.mrb[0].mxu0 %vm655_vm2, %v647_v35  ;;  %1371 = vmatmul.mubr.msk.bf16.vlgmr.msra.gmra.mrb[0].mxu1 %vm655_vm2, %v648_v36 }
  0xa5   : > { %1375 = vmatpush3.bf16.xpose.msra.mxu0 %v752_v39  ;;  %1381 = vmatpush3.bf16.xpose.msra.mxu1 %v798_v40 }
  0xa6   : > { %1376 = vmatprep.mubr.msk.bf16.mxu0 %vm1456_vm0, %v1455_v2  ;;  %1382 = vmatprep.mubr.msk.bf16.mxu1 %vm1456_vm0, %v1455_v2 }
  0xa7   : > { %1386 = vmatprep.subr.bf16.mxu0 %v1455_v2  ;;  %1392 = vmatprep.subr.bf16.mxu1 %v1455_v2 }
  0xac   : > { %1377 = vmatmul.mubr.msk.bf16.vlgmr.msra.gmra.mrb[4].mxu0 %vm655_vm2, %v649_v43  ;;  %1383 = vmatmul.mubr.msk.bf16.vlgmr.msra.gmra.mrb[4].mxu1 %vm655_vm2, %v650_v44 }
  0xad   : > { %1388 = vmatprep.mubr.msk.bf16.mxu0 %vm1456_vm0, %v1455_v2  ;;  %1394 = vmatprep.mubr.msk.bf16.mxu1 %vm1456_vm0, %v1455_v2 }
 0x177   : > { %v696_v45 = vpop.f32.mrb[0].mxu0  ;;  %v742_v46 = vpop.f32.mrb[0].mxu1 }
 0x178   : > { %v842_v47 = vsel %vm208_vm1, %v696_v45, -1e+20  ;;  %v843_v48 = vsel %vm208_vm1, %v742_v46, -1e+20  ;;  %v1366_v49 = vpop.f32.mrb[1].mxu0  ;;  %v1372_v50 = vpop.f32.mrb[1].mxu1 }
 0x179   : > { %v846_v51 = vmul.f32 0.17677669, %v842_v47  ;;  %v847_v52 = vmul.f32 0.17677669, %v843_v48  ;;  %v699_v53 = vpop.f32.mrb[2].mxu0  ;;  %v745_v54 = vpop.f32.mrb[2].mxu1 }
 0x17a   : > { %v1367_v55 = vpop.f32.mrb[3].mxu0  ;;  %v1373_v56 = vpop.f32.mrb[3].mxu1 }
 0x17b   : > { %v853_v57 = vsel %vm655_vm2, %v847_v52, -inf  ;;  %v850_v58 = vsel %vm655_vm2, %v846_v51, -inf }
 0x17c   : > { %854 = vmax.xlane.f32.xlu1 %v853_v57  ;;  %851 = vmax.xlane.f32.xlu0 %v850_v58 }
 0x17f   : > { %v788_v59 = vpop.f32.mrb[4].mxu0  ;;  %v834_v60 = vpop.f32.mrb[4].mxu1 }
 0x180   : > { %v844_v61 = vsel %vm208_vm1, %v788_v59, -1e+20  ;;  %v845_v62 = vsel %vm208_vm1, %v834_v60, -1e+20  ;;  %v1378_v63 = vpop.f32.mrb[5].mxu0  ;;  %v1384_v0 = vpop.f32.mrb[5].mxu1 }
 0x181   : > { %v848_v1 = vmul.f32 0.17677669, %v844_v61  ;;  %v791_v3 = vpop.f32.mrb[6].mxu0  ;;  %v837_v6 = vpop.f32.mrb[6].mxu1  ;;  %v849_v9 = vmul.f32 0.17677669, %v845_v62 }
 0x182   : > { %v1379_v7 = vpop.f32.mrb[7].mxu0  ;;  %v1385_v8 = vpop.f32.mrb[7].mxu1 }
 0x183   : > { %v856_v10 = vsel %vm655_vm2, %v848_v1, -inf  ;;  %v859_v11 = vsel %vm655_vm2, %v849_v9, -inf }
 0x184   : > { %857 = vmax.xlane.f32.xlu0 %v856_v10 }
 0x188   : > { %860 = vmax.xlane.f32.xlu0 %v859_v11 }
 0x18d   : > { %502 = vrot.lane.b32.xlu1 %v207_v4, %s1453_s22 }
 0x209   : > { %v855_v5 = vpop.xlane.xlu1 %854  ;;  %v852_v12 = vpop.xlane.xlu0 %851 }
 0x20a   : > { %v863_v13 = vsub.f32 %v847_v52, %v855_v5  ;;  %v862_v15 = vsub.f32 %v846_v51, %v852_v12 }
 0x20c   : > { %v868_v16 = vmul.f32 1.442695, %v863_v13  ;;  %v866_v17 = vmul.f32 1.442695, %v862_v15 }
 0x20d   : > { %v503_v33 = vpop.permute.xlu1 %502 }
 0x20e   : > { %1428 = vpow2.f32 %v868_v16 }
 0x20f   : > { %1430 = vpow2.f32 %v866_v17 }
 0x211   : > { %v858_v23 = vpop.xlane.xlu0 %857 }
 0x212   : > { %v864_v26 = vsub.f32 %v848_v1, %v858_v23 }
 0x214   : > { %v870_v28 = vmul.f32 1.442695, %v864_v26 }
 0x215   : > { %v861_v24 = vpop.xlane.xlu0 %860 }
 0x216   : > { %v865_v25 = vsub.f32 %v849_v9, %v861_v24 }
 0x218   : > { %v1597_v18 = vpop.eup %1428  ;;  %v872_v27 = vmul.f32 1.442695, %v865_v25 }
 0x219   : > { %v1599_v19 = vpop.eup %1430  ;;  %v877_v20 = vsel %vm655_vm2, %v1597_v18, 0.0 }
 0x21a   : > { %v874_v22 = vsel %vm655_vm2, %v1599_v19, 0.0  ;;  %878 = vadd.xlane.f32.xlu0 %v877_v20  ;;  %1432 = vpow2.f32 %v872_v27 }
 0x21b   : > { %875 = vadd.xlane.f32.xlu1 %v874_v22  ;;  %1434 = vpow2.f32 %v870_v28 }
 0x224   : > { %v1607_v29 = vpop.eup %1432 }
 0x225   : > { %v1609_v30 = vpop.eup %1434  ;;  %v883_v31 = vsel %vm655_vm2, %v1607_v29, 0.0 }
 0x226   : > { %v880_v32 = vsel %vm655_vm2, %v1609_v30, 0.0 }
 0x22c   : > { %508 = vrot.lane.b32.xlu1 %v207_v4, %s1452_s21 }
 0x230   : > { %505 = vrot.lane.b32.xlu0 %v207_v4, %s1454_s23 }
 0x24f   : > { %884 = vadd.xlane.f32.xlu0 %v883_v31 }
 0x250   : > { %881 = vadd.xlane.f32.xlu1 %v880_v32 }
 0x2a7   : > { %v879_v34 = vpop.xlane.xlu0 %878 }
 0x2a8   : > { %v876_v35 = vpop.xlane.xlu1 %875  ;;  %1436 = vrcp.f32 %v879_v34 }
 0x2a9   : > { %1438 = vrcp.f32 %v876_v35 }
 0x2ab   : > { %v506_v36 = vpop.permute.xlu0 %505 }
 0x2ac   : > { %v509_v37 = vpop.permute.xlu1 %508  ;;  %v511_v38 = vcombine.low %v207_v4, %v506_v36  ;;  %v512_v39 = vcombine.high %v207_v4, %v506_v36 }
 0x2ad   : > { %v527_v40 = vcombine.low %v503_v33, %v509_v37  ;;  %v528_v41 = vcombine.high %v503_v33, %v509_v37 }
 0x2ae   : > { %v519_v42 = vrot.slane %v511_v38, %v1519_v14  ;;  %v526_v43 = vrot.slane %v512_v39, %v1519_v14 }
 0x2af   : > { %v535_v44 = vrot.slane %v527_v40, %v1519_v14  ;;  %v542_v45 = vrot.slane %v528_v41, %v1519_v14 }
 0x2b1   : > { %v543_v46 = vcombine.low %v519_v42, %v535_v44  ;;  %v544_v47 = vcombine.high %v519_v42, %v535_v44  ;;  %v559_v48 = vcombine.low %v526_v43, %v542_v45  ;;  %v560_v49 = vcombine.high %v526_v43, %v542_v45 }
 0x2b2   : > { %v1437_v7 = vpop.eup %1436 }
 0x2b3   : > { %v551_v50 = vrot.slane %v543_v46, %v1522_v21  ;;  %v558_v51 = vrot.slane %v544_v47, %v1522_v21  ;;  %v567_v52 = vrot.slane %v559_v48, %v1522_v21  ;;  %v574_v53 = vrot.slane %v560_v49, %v1522_v21  ;;  %v1439_v10 = vpop.eup %1438 }
 0x2b4   : > { %v890_v13 = vmul.f32 %v1439_v10, %v1599_v19  ;;  %v891_v15 = vmul.f32 %v1437_v7, %v1597_v18 }
 0x2b5   : > { %v579_v54 = vcombine.low %v551_v50, %v558_v51  ;;  %v1332_v55 = vcombine.high %v551_v50, %v558_v51  ;;  %v595_v56 = vcombine.low %v567_v52, %v574_v53  ;;  %v1333_v57 = vcombine.high %v567_v52, %v574_v53 }
 0x2b6   : > { %v894_v25 = vpack.c.bf16 %v890_v13, %v890_v13  ;;  %v895_v26 = vpack.c.bf16 %v891_v15, %v891_v15 }
 0x2b7   : > { %v586_v58 = vrot.slane %v579_v54, %v1519_v14  ;;  %v594_v59 = vrot.slane %v1332_v55, %v1519_v14  ;;  %v602_v60 = vrot.slane %v595_v56, %v1519_v14  ;;  %v610_v61 = vrot.slane %v1333_v57, %v1519_v14 }
 0x2b9   : > { %v611_v62 = vcombine.low %v586_v58, %v594_v59  ;;  %v612_v63 = vcombine.high %v586_v58, %v594_v59  ;;  %v627_v0 = vcombine.low %v602_v60, %v610_v61  ;;  %v628_v1 = vcombine.high %v602_v60, %v610_v61 }
 0x2bb   : > { %v619_v3 = vrot.slane %v611_v62, %v1522_v21  ;;  %v626_v6 = vrot.slane %v612_v63, %v1522_v21  ;;  %v635_v8 = vrot.slane %v627_v0, %v1522_v21  ;;  %v642_v9 = vrot.slane %v628_v1, %v1522_v21 }
 0x2bd   : > { %v643_v11 = vcombine.low %v619_v3, %v635_v8  ;;  %v644_v4 = vcombine.high %v619_v3, %v635_v8  ;;  %v645_v5 = vcombine.low %v626_v6, %v642_v9  ;;  %v646_v12 = vcombine.high %v626_v6, %v642_v9 }
 0x2bf   : > { %v898_v16 = vpack.c.bf16 %v643_v11, %v643_v11  ;;  %v899_v17 = vpack.c.bf16 %v644_v4, %v644_v4  ;;  %v900_v23 = vpack.c.bf16 %v645_v5, %v645_v5  ;;  %v901_v24 = vpack.c.bf16 %v646_v12, %v646_v12 }
 0x2c1   : > { %v907_v20 = vsel %vm905_vm3, %v898_v16, 0  ;;  %v953_v22 = vsel %vm905_vm3, %v899_v17, 0  ;;  %v999_v18 = vsel %vm905_vm3, %v900_v23, 0  ;;  %v1045_v19 = vsel %vm905_vm3, %v901_v24, 0 }
 0x2c2   : > { %1387 = vmatpush3.bf16.msra.mxu0 %v907_v20  ;;  %1393 = vmatpush3.bf16.msra.mxu1 %v953_v22 }
 0x2c3   : > { %1398 = vmatprep.subr.bf16.mxu0 %v1455_v2  ;;  %1404 = vmatprep.subr.bf16.mxu1 %v1455_v2 }
 0x2c5   : > { %1389 = vmatmul.mubr.msk.bf16.vlgmr.msra.gmra.mrb[8].mxu0 %vm655_vm2, %v894_v25  ;;  %1395 = vmatmul.mubr.msk.bf16.vlgmr.msra.gmra.mrb[8].mxu1 %vm655_vm2, %v895_v26 }
 0x2c6   : > { %1399 = vmatpush3.bf16.msra.mxu0 %v999_v18  ;;  %1405 = vmatpush3.bf16.msra.mxu1 %v1045_v19 }
 0x2c7   : > { %1400 = vmatprep.mubr.msk.bf16.mxu0 %vm1456_vm0, %v1455_v2  ;;  %1406 = vmatprep.mubr.msk.bf16.mxu1 %vm1456_vm0, %v1455_v2 }
 0x2dc   : > { %v885_v27 = vpop.xlane.xlu0 %884 }
 0x2dd   : > { %v882_v28 = vpop.xlane.xlu1 %881  ;;  %1440 = vrcp.f32 %v885_v27 }
 0x2de   : > { %1442 = vrcp.f32 %v882_v28 }
 0x2e7   : > { %v1441_v31 = vpop.eup %1440 }
 0x2e8   : > { %v1443_v32 = vpop.eup %1442  ;;  %v893_v33 = vmul.f32 %v1441_v31, %v1607_v29 }
 0x2e9   : > { %v892_v34 = vmul.f32 %v1443_v32, %v1609_v30 }
 0x2ea   : > { %v897_v35 = vpack.c.bf16 %v893_v33, %v893_v33 }
 0x2eb   : > { %v896_v36 = vpack.c.bf16 %v892_v34, %v892_v34 }
 0x2ec   : > { %1407 = vmatmul.mubr.msk.bf16.vlgmr.msra.gmra.mrb[12].mxu1 %vm655_vm2, %v897_v35 }
 0x2ed   : > { %1401 = vmatmul.mubr.msk.bf16.vlgmr.msra.gmra.mrb[12].mxu0 %vm655_vm2, %v896_v36 }
 0x398   : > { %v943_v37 = vpop.f32.mrb[8].mxu0  ;;  %v989_v38 = vpop.f32.mrb[8].mxu1 }
 0x399   : > { %v1390_v39 = vpop.f32.mrb[9].mxu0  ;;  %v1396_v2 = vpop.f32.mrb[9].mxu1 }
 0x39a   : > { %v946_v40 = vpop.f32.mrb[10].mxu0  ;;  %v992_v41 = vpop.f32.mrb[10].mxu1 }
 0x39b   : > { %v1391_v42 = vpop.f32.mrb[11].mxu0  ;;  %v1397_v43 = vpop.f32.mrb[11].mxu1 }
 0x3bf   : > { %v1081_v44 = vpop.f32.mrb[12].mxu1 }
 0x3c0   : > { %v1035_v45 = vpop.f32.mrb[12].mxu0  ;;  %v1103_v46 = vcombine.low %v989_v38, %v1081_v44  ;;  %v1104_v29 = vcombine.high %v989_v38, %v1081_v44  ;;  %v1408_v47 = vpop.f32.mrb[13].mxu1 }
 0x3c1   : > { %v1087_v30 = vcombine.low %v943_v37, %v1035_v45  ;;  %v1088_v48 = vcombine.high %v943_v37, %v1035_v45  ;;  %v1402_v49 = vpop.f32.mrb[13].mxu0  ;;  %v1084_v50 = vpop.f32.mrb[14].mxu1 }
 0x3c2   : > { %v1111_v51 = vrot.slane %v1103_v46, %v1519_v14  ;;  %v1118_v52 = vrot.slane %v1104_v29, %v1519_v14  ;;  %v1038_v53 = vpop.f32.mrb[14].mxu0  ;;  %v1409_v54 = vpop.f32.mrb[15].mxu1 }
 0x3c3   : > { %v1095_v55 = vrot.slane %v1087_v30, %v1519_v14  ;;  %v1102_v56 = vrot.slane %v1088_v48, %v1519_v14  ;;  %v1403_v57 = vpop.f32.mrb[15].mxu0 }
 0x3c5   : > { %v1119_v58 = vcombine.low %v1095_v55, %v1111_v51  ;;  %v1120_v59 = vcombine.high %v1095_v55, %v1111_v51  ;;  %v1135_v60 = vcombine.low %v1102_v56, %v1118_v52  ;;  %v1136_v61 = vcombine.high %v1102_v56, %v1118_v52 }
 0x3c7   : > { %v1127_v62 = vrot.slane %v1119_v58, %v1522_v21  ;;  %v1134_v63 = vrot.slane %v1120_v59, %v1522_v21  ;;  %v1143_v0 = vrot.slane %v1135_v60, %v1522_v21  ;;  %v1150_v1 = vrot.slane %v1136_v61, %v1522_v21 }
 0x3c9   : > { %v1155_v3 = vcombine.low %v1127_v62, %v1134_v63  ;;  %v1342_v6 = vcombine.high %v1127_v62, %v1134_v63  ;;  %v1171_v7 = vcombine.low %v1143_v0, %v1150_v1  ;;  %v1343_v8 = vcombine.high %v1143_v0, %v1150_v1 }
 0x3cb   : > { %v1162_v9 = vrot.slane %v1155_v3, %v1519_v14  ;;  %v1170_v10 = vrot.slane %v1342_v6, %v1519_v14  ;;  %v1178_v11 = vrot.slane %v1171_v7, %v1519_v14  ;;  %v1186_v4 = vrot.slane %v1343_v8, %v1519_v14 }
 0x3cd   : > { %v1188_v5 = vcombine.high %v1162_v9, %v1170_v10  ;;  %v1204_v12 = vcombine.high %v1178_v11, %v1186_v4  ;;  %v1187_v13 = vcombine.low %v1162_v9, %v1170_v10  ;;  %v1203_v15 = vcombine.low %v1178_v11, %v1186_v4 }
 0x3cf   : > { %v1202_v16 = vrot.slane %v1188_v5, %v1522_v21  ;;  %v1218_v17 = vrot.slane %v1204_v12, %v1522_v21  ;;  %v1195_v20 = vrot.slane %v1187_v13, %v1522_v21  ;;  %v1211_v22 = vrot.slane %v1203_v15, %v1522_v21 }
 0x3d1   : > { %v1221_v23 = vcombine.low %v1202_v16, %v1218_v17  ;;  %v1220_v24 = vcombine.high %v1195_v20, %v1211_v22  ;;  %v1222_v25 = vcombine.high %v1202_v16, %v1218_v17  ;;  %v1219_v26 = vcombine.low %v1195_v20, %v1211_v22 }
 0x3d3   : > { %1228 = vrot.lane.b32.xlu1 %v1221_v23, %s1459_s27  ;;  %1224 = vrot.lane.b32.xlu0 %v1220_v24, %s1460_s28 }
 0x3d7   : > { %1232 = vrot.lane.b32.xlu1 %v1222_v25, %s1461_s29 }
 0x445   : > { %v1229_v14 = vpop.permute.xlu1 %1228  ;;  %v1225_v18 = vpop.permute.xlu0 %1224 }
 0x446   : > { %v1235_v19 = vsel %vm655_vm2, %v1219_v26, %v1225_v18 }
 0x447   : > { %v1237_v27 = vsel %vm1236_vm4, %v1235_v19, %v1229_v14 }
 0x449   : > { %v1233_v21 = vpop.permute.xlu1 %1232 }
 0x44a   : > { %v1239_v28 = vsel %vm1238_vm5, %v1237_v27, %v1233_v21 }
 0x44b   : > { %1241 = vst.msk [vmem:[%s199_s5] sm:$0xff] %vm1240_vm6, %v1239_v28 }
 0x44c PF: > { %s13_s12 = sadd.s32 1, %s1450_s12  }
 0x44d   : > { %p10_p4 = scmp.ge.s32.totalorder %s13_s12, 4  }
 0x44f   :  { %12 = sbr.rel (!%p10_p4) target bundleno = 1 (0x1), region = 68 }

// kernel: transformer_forward.37
= control target key start
LH: loop header
LB: loop body
LE: loop exit
PB: predicated region body
PF: predicated region fallthrough
CT: control target
= control target key end

     0   :  { %v112_v0 = vmov 0.0   ;;  %vm113_vm0 = vmmov 0   ;;  %vm41_vm1 = vcmask 261120   ;;  %vm86_vm2 = vcmask 523264   ;;  %s155_s1 = inlined_call_operand.vmem [shape: bf16[32,64], index: 1, kind: input, shape index: {}]   ;;  %s156_s0 = inlined_call_operand.vmem [shape: f32[16,32], index: 0, kind: input, shape index: {}]   ;;  %s157_s2 = inlined_call_operand.vmem [shape: f32[1,64], index: 2, kind: input, shape index: {}]   ;;  %s158_s3 = inlined_call_operand.vmem [shape: f32[16,64], index: 3, kind: output, shape index: {}]  }
   0x1   :  { %100 = vmatprep.subr.bf16.mxu0 %v112_v0  ;;  %v110_v1 = vld [vmem:[%s155_s1] sm:$0xff]   ;;  %104 = vmatprep.mubr.msk.bf16.mxu0 %vm113_vm0, %v112_v0  ;;  %v111_v2 = vld [vmem:[%s155_s1 + $0x8] sm:$0xff]  }
   0x2   :  { %101 = vmatpush3.bf16.msra.mxu0 %v110_v1  ;;  %v15_v3 = vld [vmem:[%s156_s0] sm:$0xff]  ;;  %v16_v4 = vld [vmem:[%s156_s0 + $0x8] sm:$0xff] }
   0x3   :  { %102 = vmatprep.subr.bf16.mxu0 %v112_v0  ;;  %v17_v5 = vpack.c.bf16 %v16_v4, %v15_v3  ;;  %v93_v6 = vld [vmem:[%s157_s2] ss:$0 sm:$0xff] }
   0x6   :  { %103 = vmatpush3.bf16.msra.mxu0 %v111_v2 }
   0x9   :  { %105 = vmatmul.mubr.msk.bf16.vlgmr.msra.gmra.mrb[0].mxu0 %vm41_vm1, %v17_v5 }
  0xdc   :  { %v79_v7 = vpop.f32.mrb[0].mxu0 }
  0xdd   :  { %v80_v8 = vadd.f32 %v93_v6, %v79_v7  ;;  %v106_v9 = vpop.f32.mrb[1].mxu0 }
  0xde   :  { %v82_v10 = vpop.f32.mrb[2].mxu0 }
  0xdf   :  { %87 = vst.msk [vmem:[%s158_s3] sm:$0xff] %vm86_vm2, %v80_v8  ;;  %v83_v11 = vadd.f32 %v93_v6, %v82_v10  ;;  %v107_v12 = vpop.f32.mrb[3].mxu0 }
  0xe1   :  { %88 = vst.msk [vmem:[%s158_s3 + $0x8] sm:$0xff] %vm86_vm2, %v83_v11 }

// kernel: transformer_forward.28
= control target key start
LH: loop header
LB: loop body
LE: loop exit
PB: predicated region body
PF: predicated region fallthrough
CT: control target
= control target key end

     0   :  { %v290_v0 = vmov 0.0   ;;  %vm291_vm0 = vmmov 0   ;;  %vm53_vm1 = vcmask 261120   ;;  %vm140_vm2 = vcmask 523264   ;;  %s381_s1 = inlined_call_operand.vmem [shape: bf16[32,64], index: 1, kind: input, shape index: {}]   ;;  %s382_s0 = inlined_call_operand.vmem [shape: f32[16,32], index: 0, kind: input, shape index: {}]   ;;  %s383_s3 = inlined_call_operand.vmem [shape: bf16[64,32], index: 3, kind: input, shape index: {}]   ;;  %s384_s2 = inlined_call_operand.vmem [shape: f32[1,64], index: 2, kind: input, shape index: {}]   ;;  %s385_s4 = inlined_call_operand.vmem [shape: f32[1,32], index: 4, kind: input, shape index: {}]   ;;  %s386_s5 = inlined_call_operand.vmem [shape: f32[1,32], index: 5, kind: input, shape index: {}]   ;;  %s387_s6 = inlined_call_operand.vmem [shape: f32[1,32], index: 6, kind: input, shape index: {}]   ;;  %s388_s7 = inlined_call_operand.vmem [shape: f32[16,32], index: 7, kind: output, shape index: {}]  }
   0x1   :  { %258 = vmatprep.subr.bf16.mxu0 %v290_v0  ;;  %v280_v1 = vld [vmem:[%s381_s1] sm:$0xff]   ;;  %262 = vmatprep.mubr.msk.bf16.mxu0 %vm291_vm0, %v290_v0  ;;  %v281_v2 = vld [vmem:[%s381_s1 + $0x8] sm:$0xff]   ;;  %v284_v8 = vld [vmem:[%s383_s3 + $0x10] sm:$0xff]  }
   0x2   :  { %266 = vmatprep.subr.bf16.mxu1 %v290_v0  ;;  %274 = vmatprep.mubr.msk.bf16.mxu1 %vm291_vm0, %v290_v0  ;;  %v27_v3 = vld [vmem:[%s382_s0] sm:$0xff]  ;;  %v28_v4 = vld [vmem:[%s382_s0 + $0x8] sm:$0xff]  ;;  %v285_v9 = vld [vmem:[%s383_s3 + $0x18] sm:$0xff]  }
   0x3   :  { %259 = vmatpush3.bf16.msra.mxu0 %v280_v1  ;;  %v282_v5 = vld [vmem:[%s383_s3] sm:$0xff]   ;;  %v283_v6 = vld [vmem:[%s383_s3 + $0x8] sm:$0xff]   ;;  %v29_v7 = vpack.c.bf16 %v28_v4, %v27_v3 }
   0x4   :  { %260 = vmatprep.subr.bf16.mxu0 %v290_v0  ;;  %267 = vmatpush3.bf16.msra.mxu1 %v282_v5  ;;  %v238_v10 = vld [vmem:[%s384_s2] ss:$0 sm:$0xff] }
   0x5   :  { %268 = vmatprep.subr.bf16.mxu1 %v290_v0  ;;  %v242_v20 = vld [vmem:[%s385_s4] ss:$0 sm:$0xff] }
   0x6   :  { %v248_v48 = vld [vmem:[%s386_s5] ss:$0 sm:$0xff] }
   0x7   :  { %261 = vmatpush3.bf16.msra.mxu0 %v281_v2  ;;  %v249_v50 = vld [vmem:[%s387_s6] ss:$0 sm:$0xff] }
   0x8   :  { %269 = vmatpush3.bf16.msra.mxu1 %v283_v6 }
   0x9   :  { %270 = vmatprep.subr.bf16.mxu1 %v290_v0 }
   0xa   :  { %263 = vmatmul.mubr.msk.bf16.vlgmr.msra.gmra.mrb[0].mxu0 %vm53_vm1, %v29_v7 }
   0xc   :  { %271 = vmatpush3.bf16.msra.mxu1 %v284_v8 }
   0xd   :  { %272 = vmatprep.subr.bf16.mxu1 %v290_v0 }
  0x10   :  { %273 = vmatpush3.bf16.msra.mxu1 %v285_v9 }
  0xdd   :  { %v91_v11 = vpop.f32.mrb[0].mxu0 }
  0xde   :  { %v92_v12 = vadd.f32 %v238_v10, %v91_v11  ;;  %v264_v13 = vpop.f32.mrb[1].mxu0 }
  0xdf   :  { %v94_v14 = vpop.f32.mrb[2].mxu0 }
  0xe0   :  { %v95_v15 = vadd.f32 %v238_v10, %v94_v14  ;;  %v265_v16 = vpop.f32.mrb[3].mxu0  ;;  %v98_v17 = vmax.f32 %v92_v12, 0.0 }
  0xe2   :  { %v99_v18 = vmax.f32 %v95_v15, 0.0 }
  0xe4   :  { %v100_v19 = vpack.c.bf16 %v99_v18, %v98_v17 }
  0xe6   :  { %275 = vmatmul.mubr.msk.bf16.vlgmr.msra.gmra.mrb[0].mxu1 %vm140_vm2, %v100_v19 }
 0x1b9   :  { %v178_v21 = vpop.f32.mrb[0].mxu1 }
 0x1ba   :  { %v179_v22 = vadd.f32 %v242_v20, %v178_v21  ;;  %v276_v23 = vpop.f32.mrb[1].mxu1 }
 0x1bb   :  { %v181_v24 = vpop.f32.mrb[2].mxu1 }
 0x1bc   :  { %v182_v25 = vadd.f32 %v242_v20, %v181_v24  ;;  %v277_v26 = vpop.f32.mrb[3].mxu1  ;;  %v185_v27 = vadd.f32 %v179_v22, %v27_v3 }
 0x1be   :  { %v189_v28 = vsel %vm53_vm1, %v185_v27, 0.0  ;;  %v186_v29 = vadd.f32 %v182_v25, %v28_v4 }
 0x1bf   :  { %190 = vadd.xlane.f32.xlu0 %v189_v28 }
 0x1c0   :  { %v192_v30 = vsel %vm53_vm1, %v186_v29, 0.0 }
 0x1c3   :  { %193 = vadd.xlane.f32.xlu0 %v192_v30 }
 0x24c   :  { %v191_v31 = vpop.xlane.xlu0 %190 }
 0x24d   :  { %v196_v32 = vmul.f32 0.03125, %v191_v31 }
 0x24f   :  { %v198_v33 = vsub.f32 %v185_v27, %v196_v32 }
 0x250   :  { %v194_v34 = vpop.xlane.xlu0 %193 }
 0x251   :  { %v197_v35 = vmul.f32 0.03125, %v194_v34  ;;  %v200_v36 = vmul.f32 %v198_v33, %v198_v33 }
 0x253   :  { %v199_v37 = vsub.f32 %v186_v29, %v197_v35  ;;  %v202_v38 = vsel %vm53_vm1, %v200_v36, 0.0 }
 0x254   :  { %203 = vadd.xlane.f32.xlu1 %v202_v38 }
 0x255   :  { %v201_v39 = vmul.f32 %v199_v37, %v199_v37 }
 0x257   :  { %v205_v40 = vsel %vm53_vm1, %v201_v39, 0.0 }
 0x258   :  { %206 = vadd.xlane.f32.xlu1 %v205_v40 }
 0x2e1   :  { %v204_v41 = vpop.xlane.xlu1 %203 }
 0x2e2   :  { %v208_v42 = vmul.f32 0.03125, %v204_v41 }
 0x2e4   :  { %v210_v43 = vadd.f32 1e-05, %v208_v42 }
 0x2e5   :  { %v207_v44 = vpop.xlane.xlu1 %206 }
 0x2e6   :  { %286 = vrsqrt.f32 %v210_v43  ;;  %v209_v45 = vmul.f32 0.03125, %v207_v44 }
 0x2e8   :  { %v211_v46 = vadd.f32 1e-05, %v209_v45 }
 0x2ea   :  { %288 = vrsqrt.f32 %v211_v46 }
 0x2f0   :  { %v287_v47 = vpop.eup %286 }
 0x2f1   :  { %v214_v49 = vmul.f32 %v287_v47, %v198_v33 }
 0x2f3   :  { %v222_v51 = vmul.f32 %v248_v48, %v214_v49 }
 0x2f4   :  { %v289_v52 = vpop.eup %288 }
 0x2f5   :  { %v230_v53 = vadd.f32 %v249_v50, %v222_v51  ;;  %v215_v54 = vmul.f32 %v289_v52, %v199_v37 }
 0x2f7   :  { %232 = vst.msk [vmem:[%s388_s7] sm:$0xff] %vm53_vm1, %v230_v53  ;;  %v223_v55 = vmul.f32 %v248_v48, %v215_v54 }
 0x2f9   :  { %v231_v56 = vadd.f32 %v249_v50, %v223_v55 }
 0x2fb   :  { %233 = vst.msk [vmem:[%s388_s7 + $0x8] sm:$0xff] %vm53_vm1, %v231_v56 }

// kernel: transformer_forward.26
= control target key start
LH: loop header
LB: loop body
LE: loop exit
PB: predicated region body
PF: predicated region fallthrough
CT: control target
= control target key end

     0   :  { %s1540_s15 = smov 0   ;;  %s1727_s0 = inlined_call_operand.vmem [shape: f32[2,8,32], index: 0, kind: input, shape index: {}]   ;;  %s1728_s1 = inlined_call_operand.vmem [shape: f32[2,8,32], index: 1, kind: input, shape index: {}]   ;;  %s1729_s2 = inlined_call_operand.vmem [shape: f32[2,8,32], index: 2, kind: input, shape index: {}]   ;;  %s1730_s3 = inlined_call_operand.vmem [shape: s32[2,1,8], index: 3, kind: input, shape index: {}]   ;;  %s1731_s4 = inlined_call_operand.vmem [shape: f32[2,8,32], index: 4, kind: output, shape index: {}]  }
   0x1 LB: > { %s1370_s16 = sadd.s32 4294967295, %s1502_s15   ;;  %p1374_p0 = scmp.ge.s32.totalorder %s1502_s15, 1  ;;  %s1502_s15 = sphi %s1540_s15, %s14_s15  }
   0x2   : > { %p187_p1 = scmp.lt.s32.totalorder %s1502_s15, 3 }
   0x4   : > { %p188_p2 = pnand %p1374_p0, %p187_p1 }
   0x5   : > { %p222_p3 = scmp.lt.s32.totalorder (!%p188_p2), %s1370_s16, 1  ;;  %s1504_s24 = smov (!%p188_p2), 104   ;;  %v1507_v2 = vmov (!%p188_p2), 0.0   ;;  %vm1508_vm0 = vmmov (!%p188_p2), 0   ;;  %v1509_v3 = vmov (!%p188_p2), 1983009808   ;;  %v262_v5 = vlaneseq (!%p188_p2) }
   0x6   : > { %191 = sbr.rel (%p188_p2) target bundleno = 1100 (0x44c), region = 36  ;;  %s1505_s25 = smov (!%p188_p2), 120   ;;  %1413 = vmatprep.subr.bf16.mxu0 (!%p188_p2), %v1507_v2  ;;  %1419 = vmatprep.subr.bf16.mxu1 (!%p188_p2), %v1507_v2  ;;  %v260_v4 = vunpack.c.l.s4 (!%p188_p2), %v1509_v3  ;;  %v1510_v6 = vmov (!%p188_p2), 1934713408   ;;  %vm693_vm1 = vcmask (!%p188_p2), 64512   ;;  %vm947_vm4 = vcmask (!%p188_p2), 1043456  }
   0x7   : > { %s1506_s26 = smov (!%p188_p2), 112   ;;  %1415 = vmatprep.mubr.msk.bf16.mxu0 (!%p188_p2), %vm1508_vm0, %v1507_v2  ;;  %1421 = vmatprep.mubr.msk.bf16.mxu1 (!%p188_p2), %vm1508_vm0, %v1507_v2  ;;  %v292_v7 = vunpack.c.l.s4 (!%p188_p2), %v1510_v6  ;;  %v1573_v9 = vshrl.u32 (!%p188_p2), %v262_v5, 7  ;;  %s1512_s7 = smov (!%p188_p2), 16   ;;  %vm1278_vm5 = vcmask (!%p188_p2), 130048   ;;  %vm1280_vm6 = vcmask (!%p188_p2), 195584  }
   0x8   : > { %v261_v8 = vunpack.c.0.s8 (!%p188_p2), %v260_v4  ;;  %s1513_s8 = smov (!%p188_p2), 8   ;;  %s1514_s9 = smov (!%p188_p2), 24   ;;  %vm1282_vm7 = vcmask (!%p188_p2), 261120  }
   0x9   : > { %v293_v12 = vunpack.c.0.s8 (!%p188_p2), %v292_v7 }
   0xa   : > { %v1576_v13 = vsub.s32 (!%p188_p2), %v261_v8, %v1573_v9 }
   0xb   : > { %v1579_v20 = vsub.s32 (!%p188_p2), %v293_v12, %v1573_v9 }
   0xd   : > { %s1733_s16 = smov (!%p222_p3, %s1370_s16), 1 }
   0xe   : > { %s1551_s17 = sshll.u32 %s1733_s16, 3  ;;  %s236_s29 = scalar_lea.vmem %s1730_s3, %s1733_s16 }
   0xf   : > { %s229_s20 = scalar_lea.vmem %s1728_s1, %s1551_s17  ;;  %s225_s23 = scalar_lea.vmem %s1727_s0, %s1551_s17 }
  0x10   : > { %v245_v0 = vld [vmem:[%s229_s20] sm:$0xff]  ;;  %s233_s6 = scalar_lea.vmem %s1729_s2, %s1551_s17  ;;  %s240_s12 = scalar_lea.vmem %s1731_s4, %s1551_s17 }
  0x11   : > { %400 = vrot.lane.b32.xlu1 %v245_v0, %s1504_s24  ;;  %394 = vrot.lane.b32.xlu0 %v245_v0, %s1505_s25  ;;  %v244_v1 = vld [vmem:[%s225_s23] sm:$0xff] }
  0x15   : > { %397 = vrot.lane.b32.xlu0 %v245_v0, %s1506_s26  ;;  %248 = vrot.lane.b32.xlu1 %v244_v1, %s1505_s25 }
  0x19   : > { %251 = vrot.lane.b32.xlu0 %v244_v1, %s1506_s26  ;;  %254 = vrot.lane.b32.xlu1 %v244_v1, %s1504_s24 }
  0x83   : > { %v401_v10 = vpop.permute.xlu1 %400  ;;  %v395_v11 = vpop.permute.xlu0 %394 }
  0x84   : > { %v419_v14 = vcombine.low %v395_v11, %v401_v10  ;;  %v420_v15 = vcombine.high %v395_v11, %v401_v10 }
  0x86   : > { %v427_v21 = vrot.slane %v419_v14, %v1576_v13  ;;  %v434_v22 = vrot.slane %v420_v15, %v1576_v13 }
  0x87   : > { %v398_v16 = vpop.permute.xlu0 %397  ;;  %v249_v17 = vpop.permute.xlu1 %248 }
  0x88   : > { %v403_v18 = vcombine.low %v245_v0, %v398_v16  ;;  %v404_v19 = vcombine.high %v245_v0, %v398_v16 }
  0x8a   : > { %v411_v23 = vrot.slane %v403_v18, %v1576_v13  ;;  %v418_v24 = vrot.slane %v404_v19, %v1576_v13 }
  0x8b   : > { %v252_v25 = vpop.permute.xlu0 %251  ;;  %v255_v26 = vpop.permute.xlu1 %254 }
  0x8c   : > { %v435_v27 = vcombine.low %v411_v23, %v427_v21  ;;  %v436_v28 = vcombine.high %v411_v23, %v427_v21  ;;  %v451_v29 = vcombine.low %v418_v24, %v434_v22  ;;  %v452_v30 = vcombine.high %v418_v24, %v434_v22 }
  0x8d   : > { %v257_v31 = vcombine.low %v244_v1, %v252_v25  ;;  %v258_v32 = vcombine.high %v244_v1, %v252_v25  ;;  %v273_v33 = vcombine.low %v249_v17, %v255_v26  ;;  %v274_v34 = vcombine.high %v249_v17, %v255_v26 }
  0x8e   : > { %v443_v35 = vrot.slane %v435_v27, %v1579_v20  ;;  %v450_v36 = vrot.slane %v436_v28, %v1579_v20  ;;  %v459_v37 = vrot.slane %v451_v29, %v1579_v20  ;;  %v466_v38 = vrot.slane %v452_v30, %v1579_v20 }
  0x8f   : > { %v265_v39 = vrot.slane %v257_v31, %v1576_v13  ;;  %v272_v40 = vrot.slane %v258_v32, %v1576_v13  ;;  %v281_v41 = vrot.slane %v273_v33, %v1576_v13  ;;  %v288_v42 = vrot.slane %v274_v34, %v1576_v13 }
  0x90   : > { %v471_v43 = vcombine.low %v443_v35, %v450_v36  ;;  %v1381_v44 = vcombine.high %v443_v35, %v450_v36  ;;  %v487_v45 = vcombine.low %v459_v37, %v466_v38  ;;  %v1382_v46 = vcombine.high %v459_v37, %v466_v38 }
  0x91   : > { %v289_v47 = vcombine.low %v265_v39, %v281_v41  ;;  %v290_v48 = vcombine.high %v265_v39, %v281_v41  ;;  %v305_v49 = vcombine.low %v272_v40, %v288_v42  ;;  %v306_v50 = vcombine.high %v272_v40, %v288_v42 }
  0x92   : > { %v478_v51 = vrot.slane %v471_v43, %v1576_v13  ;;  %v486_v52 = vrot.slane %v1381_v44, %v1576_v13  ;;  %v494_v53 = vrot.slane %v487_v45, %v1576_v13  ;;  %v502_v54 = vrot.slane %v1382_v46, %v1576_v13  ;;  %v242_v43 = vld [vmem:[%s236_s29] sm:$0x1] }
  0x93   : > { %v297_v55 = vrot.slane %v289_v47, %v1579_v20  ;;  %v304_v56 = vrot.slane %v290_v48, %v1579_v20  ;;  %v313_v57 = vrot.slane %v305_v49, %v1579_v20  ;;  %v320_v58 = vrot.slane %v306_v50, %v1579_v20 }
  0x94   : > { %v503_v59 = vcombine.low %v478_v51, %v486_v52  ;;  %v519_v60 = vcombine.low %v494_v53, %v502_v54  ;;  %v504_v61 = vcombine.high %v478_v51, %v486_v52  ;;  %v520_v62 = vcombine.high %v494_v53, %v502_v54 }
  0x95   : > { %v325_v63 = vcombine.low %v297_v55, %v304_v56  ;;  %v1379_v0 = vcombine.high %v297_v55, %v304_v56  ;;  %v341_v1 = vcombine.low %v313_v57, %v320_v58  ;;  %v1380_v3 = vcombine.high %v313_v57, %v320_v58 }
  0x96   : > { %v511_v4 = vrot.slane %v503_v59, %v1579_v20  ;;  %v527_v5 = vrot.slane %v519_v60, %v1579_v20  ;;  %v518_v14 = vrot.slane %v504_v61, %v1579_v20  ;;  %v534_v15 = vrot.slane %v520_v62, %v1579_v20 }
  0x97   : > { %v332_v6 = vrot.slane %v325_v63, %v1576_v13  ;;  %v340_v7 = vrot.slane %v1379_v0, %v1576_v13  ;;  %v348_v8 = vrot.slane %v341_v1, %v1576_v13  ;;  %v356_v10 = vrot.slane %v1380_v3, %v1576_v13 }
  0x98   : > { %v535_v11 = vcombine.low %v511_v4, %v527_v5  ;;  %v536_v12 = vcombine.high %v511_v4, %v527_v5  ;;  %v537_v25 = vcombine.low %v518_v14, %v534_v15  ;;  %v538_v26 = vcombine.high %v518_v14, %v534_v15  ;;  %v246_v14 = vld [vmem:[%s233_s6] sm:$0xff] }
  0x99   : > { %v357_v16 = vcombine.low %v332_v6, %v340_v7  ;;  %v373_v17 = vcombine.low %v348_v8, %v356_v10  ;;  %v358_v27 = vcombine.high %v332_v6, %v340_v7  ;;  %v374_v28 = vcombine.high %v348_v8, %v356_v10 }
  0x9a   : > { %v689_v18 = vpack.c.bf16 %v535_v11, %v535_v11  ;;  %v690_v19 = vpack.c.bf16 %v536_v12, %v536_v12  ;;  %v691_v31 = vpack.c.bf16 %v537_v25, %v537_v25  ;;  %v692_v32 = vpack.c.bf16 %v538_v26, %v538_v26 }
  0x9b   : > { %v365_v21 = vrot.slane %v357_v16, %v1579_v20  ;;  %v381_v22 = vrot.slane %v373_v17, %v1579_v20  ;;  %v372_v35 = vrot.slane %v358_v27, %v1579_v20  ;;  %v388_v36 = vrot.slane %v374_v28, %v1579_v20 }
  0x9c   : > { %v698_v23 = vsel %vm693_vm1, %v689_v18, 0  ;;  %v744_v24 = vsel %vm693_vm1, %v690_v19, 0  ;;  %v790_v37 = vsel %vm693_vm1, %v691_v31, 0  ;;  %v836_v38 = vsel %vm693_vm1, %v692_v32, 0 }
  0x9d   : > { %1414 = vmatpush3.bf16.xpose.msra.mxu0 %v698_v23  ;;  %1420 = vmatpush3.bf16.xpose.msra.mxu1 %v744_v24  ;;  %v389_v29 = vcombine.low %v365_v21, %v381_v22  ;;  %v390_v30 = vcombine.high %v365_v21, %v381_v22  ;;  %v391_v39 = vcombine.low %v372_v35, %v388_v36  ;;  %vm243_vm2 = vcmp.ne.s32.totalorder %v242_v43, 0 }
  0x9e   : > { %1425 = vmatprep.subr.bf16.mxu0 %v1507_v2  ;;  %1431 = vmatprep.subr.bf16.mxu1 %v1507_v2  ;;  %v392_v40 = vcombine.high %v372_v35, %v388_v36  ;;  %v881_v44 = vsub.s32 0, %v1573_v9  ;;  %v1511_v45 = vmov 0  }
  0x9f   : > { %v685_v33 = vpack.c.bf16 %v389_v29, %v389_v29  ;;  %v686_v34 = vpack.c.bf16 %v390_v30, %v390_v30  ;;  %v687_v41 = vpack.c.bf16 %v391_v39, %v391_v39  ;;  %v878_v46 = vsel %vm243_vm2, 1, %v1511_v45 }
  0xa0   : > { %v688_v42 = vpack.c.bf16 %v392_v40, %v392_v40  ;;  %v882_v47 = vrot.slane %v878_v46, %v881_v44 }
  0xa2   : > { %vm883_vm3 = vcmp.eq.s32.totalorder %v882_v47, 1 }
  0xa4   : > { %1416 = vmatmul.mubr.msk.bf16.vlgmr.msra.gmra.mrb[0].mxu0 %vm693_vm1, %v685_v33  ;;  %1422 = vmatmul.mubr.msk.bf16.vlgmr.msra.gmra.mrb[0].mxu1 %vm693_vm1, %v686_v34 }
  0xa5   : > { %1426 = vmatpush3.bf16.xpose.msra.mxu0 %v790_v37  ;;  %1432 = vmatpush3.bf16.xpose.msra.mxu1 %v836_v38 }
  0xa6   : > { %1427 = vmatprep.mubr.msk.bf16.mxu0 %vm1508_vm0, %v1507_v2  ;;  %1433 = vmatprep.mubr.msk.bf16.mxu1 %vm1508_vm0, %v1507_v2 }
  0xa7   : > { %1437 = vmatprep.subr.bf16.mxu0 %v1507_v2  ;;  %1443 = vmatprep.subr.bf16.mxu1 %v1507_v2 }
  0xac   : > { %1428 = vmatmul.mubr.msk.bf16.vlgmr.msra.gmra.mrb[4].mxu0 %vm693_vm1, %v687_v41  ;;  %1434 = vmatmul.mubr.msk.bf16.vlgmr.msra.gmra.mrb[4].mxu1 %vm693_vm1, %v688_v42 }
  0xad   : > { %1439 = vmatprep.mubr.msk.bf16.mxu0 %vm1508_vm0, %v1507_v2  ;;  %1445 = vmatprep.mubr.msk.bf16.mxu1 %vm1508_vm0, %v1507_v2 }
 0x177   : > { %v734_v48 = vpop.f32.mrb[0].mxu0  ;;  %v780_v49 = vpop.f32.mrb[0].mxu1 }
 0x178   : > { %v884_v50 = vsel %vm883_vm3, %v734_v48, -1e+20  ;;  %v885_v51 = vsel %vm883_vm3, %v780_v49, -1e+20  ;;  %v1417_v52 = vpop.f32.mrb[1].mxu0  ;;  %v1423_v53 = vpop.f32.mrb[1].mxu1 }
 0x179   : > { %v888_v54 = vmul.f32 0.17677669, %v884_v50  ;;  %v889_v55 = vmul.f32 0.17677669, %v885_v51  ;;  %v737_v56 = vpop.f32.mrb[2].mxu0  ;;  %v783_v57 = vpop.f32.mrb[2].mxu1 }
 0x17a   : > { %v1418_v58 = vpop.f32.mrb[3].mxu0  ;;  %v1424_v59 = vpop.f32.mrb[3].mxu1 }
 0x17b   : > { %v895_v9 = vsel %vm693_vm1, %v889_v55, -inf  ;;  %v892_v60 = vsel %vm693_vm1, %v888_v54, -inf }
 0x17c   : > { %896 = vmax.xlane.f32.xlu1 %v895_v9  ;;  %893 = vmax.xlane.f32.xlu0 %v892_v60 }
 0x17f   : > { %v826_v61 = vpop.f32.mrb[4].mxu0  ;;  %v872_v62 = vpop.f32.mrb[4].mxu1 }
 0x180   : > { %v886_v63 = vsel %vm883_vm3, %v826_v61, -1e+20  ;;  %v887_v0 = vsel %vm883_vm3, %v872_v62, -1e+20  ;;  %v1429_v1 = vpop.f32.mrb[5].mxu0  ;;  %v1435_v3 = vpop.f32.mrb[5].mxu1 }
 0x181   : > { %v890_v4 = vmul.f32 0.17677669, %v886_v63  ;;  %v829_v5 = vpop.f32.mrb[6].mxu0  ;;  %v875_v6 = vpop.f32.mrb[6].mxu1  ;;  %v891_v10 = vmul.f32 0.17677669, %v887_v0 }
 0x182   : > { %v1430_v7 = vpop.f32.mrb[7].mxu0  ;;  %v1436_v8 = vpop.f32.mrb[7].mxu1 }
 0x183   : > { %v898_v11 = vsel %vm693_vm1, %v890_v4, -inf  ;;  %v901_v12 = vsel %vm693_vm1, %v891_v10, -inf }
 0x184   : > { %899 = vmax.xlane.f32.xlu0 %v898_v11 }
 0x188   : > { %902 = vmax.xlane.f32.xlu0 %v901_v12 }
 0x18d   : > { %540 = vrot.lane.b32.xlu1 %v246_v14, %s1505_s25 }
 0x209   : > { %v897_v15 = vpop.xlane.xlu1 %896  ;;  %v894_v16 = vpop.xlane.xlu0 %893 }
 0x20a   : > { %v905_v17 = vsub.f32 %v889_v55, %v897_v15  ;;  %v904_v18 = vsub.f32 %v888_v54, %v894_v16 }
 0x20c   : > { %v910_v19 = vmul.f32 1.442695, %v905_v17  ;;  %v908_v21 = vmul.f32 1.442695, %v904_v18 }
 0x20d   : > { %v541_v36 = vpop.permute.xlu1 %540 }
 0x20e   : > { %1480 = vpow2.f32 %v910_v19 }
 0x20f   : > { %1482 = vpow2.f32 %v908_v21 }
 0x211   : > { %v900_v26 = vpop.xlane.xlu0 %899 }
 0x212   : > { %v906_v29 = vsub.f32 %v890_v4, %v900_v26 }
 0x214   : > { %v912_v31 = vmul.f32 1.442695, %v906_v29 }
 0x215   : > { %v903_v27 = vpop.xlane.xlu0 %902 }
 0x216   : > { %v907_v28 = vsub.f32 %v891_v10, %v903_v27 }
 0x218   : > { %v1651_v22 = vpop.eup %1480  ;;  %v914_v30 = vmul.f32 1.442695, %v907_v28 }
 0x219   : > { %v1653_v23 = vpop.eup %1482  ;;  %v919_v24 = vsel %vm693_vm1, %v1651_v22, 0.0 }
 0x21a   : > { %v916_v25 = vsel %vm693_vm1, %v1653_v23, 0.0  ;;  %920 = vadd.xlane.f32.xlu0 %v919_v24  ;;  %1484 = vpow2.f32 %v914_v30 }
 0x21b   : > { %917 = vadd.xlane.f32.xlu1 %v916_v25  ;;  %1486 = vpow2.f32 %v912_v31 }
 0x224   : > { %v1661_v32 = vpop.eup %1484 }
 0x225   : > { %v1663_v33 = vpop.eup %1486  ;;  %v925_v34 = vsel %vm693_vm1, %v1661_v32, 0.0 }
 0x226   : > { %v922_v35 = vsel %vm693_vm1, %v1663_v33, 0.0 }
 0x22c   : > { %546 = vrot.lane.b32.xlu1 %v246_v14, %s1504_s24 }
 0x230   : > { %543 = vrot.lane.b32.xlu0 %v246_v14, %s1506_s26 }
 0x24f   : > { %926 = vadd.xlane.f32.xlu0 %v925_v34 }
 0x250   : > { %923 = vadd.xlane.f32.xlu1 %v922_v35 }
 0x2a7   : > { %v921_v37 = vpop.xlane.xlu0 %920 }
 0x2a8   : > { %v918_v38 = vpop.xlane.xlu1 %917  ;;  %1488 = vrcp.f32 %v921_v37 }
 0x2a9   : > { %1490 = vrcp.f32 %v918_v38 }
 0x2ab   : > { %v544_v39 = vpop.permute.xlu0 %543 }
 0x2ac   : > { %v547_v40 = vpop.permute.xlu1 %546  ;;  %v549_v41 = vcombine.low %v246_v14, %v544_v39  ;;  %v550_v42 = vcombine.high %v246_v14, %v544_v39 }
 0x2ad   : > { %v565_v43 = vcombine.low %v541_v36, %v547_v40  ;;  %v566_v44 = vcombine.high %v541_v36, %v547_v40 }
 0x2ae   : > { %v557_v45 = vrot.slane %v549_v41, %v1576_v13  ;;  %v564_v46 = vrot.slane %v550_v42, %v1576_v13 }
 0x2af   : > { %v573_v47 = vrot.slane %v565_v43, %v1576_v13  ;;  %v580_v48 = vrot.slane %v566_v44, %v1576_v13 }
 0x2b1   : > { %v581_v49 = vcombine.low %v557_v45, %v573_v47  ;;  %v582_v50 = vcombine.high %v557_v45, %v573_v47  ;;  %v597_v51 = vcombine.low %v564_v46, %v580_v48  ;;  %v598_v52 = vcombine.high %v564_v46, %v580_v48 }
 0x2b2   : > { %v1489_v7 = vpop.eup %1488 }
 0x2b3   : > { %v589_v53 = vrot.slane %v581_v49, %v1579_v20  ;;  %v596_v54 = vrot.slane %v582_v50, %v1579_v20  ;;  %v605_v55 = vrot.slane %v597_v51, %v1579_v20  ;;  %v612_v56 = vrot.slane %v598_v52, %v1579_v20  ;;  %v1491_v11 = vpop.eup %1490 }
 0x2b4   : > { %v932_v17 = vmul.f32 %v1491_v11, %v1653_v23  ;;  %v933_v18 = vmul.f32 %v1489_v7, %v1651_v22 }
 0x2b5   : > { %v617_v57 = vcombine.low %v589_v53, %v596_v54  ;;  %v1383_v58 = vcombine.high %v589_v53, %v596_v54  ;;  %v633_v59 = vcombine.low %v605_v55, %v612_v56  ;;  %v1384_v9 = vcombine.high %v605_v55, %v612_v56 }
 0x2b6   : > { %v936_v28 = vpack.c.bf16 %v932_v17, %v932_v17  ;;  %v937_v29 = vpack.c.bf16 %v933_v18, %v933_v18 }
 0x2b7   : > { %v624_v60 = vrot.slane %v617_v57, %v1576_v13  ;;  %v632_v61 = vrot.slane %v1383_v58, %v1576_v13  ;;  %v640_v62 = vrot.slane %v633_v59, %v1576_v13  ;;  %v648_v63 = vrot.slane %v1384_v9, %v1576_v13 }
 0x2b9   : > { %v649_v0 = vcombine.low %v624_v60, %v632_v61  ;;  %v650_v1 = vcombine.high %v624_v60, %v632_v61  ;;  %v665_v3 = vcombine.low %v640_v62, %v648_v63  ;;  %v666_v4 = vcombine.high %v640_v62, %v648_v63 }
 0x2bb   : > { %v657_v5 = vrot.slane %v649_v0, %v1579_v20  ;;  %v664_v6 = vrot.slane %v650_v1, %v1579_v20  ;;  %v673_v8 = vrot.slane %v665_v3, %v1579_v20  ;;  %v680_v10 = vrot.slane %v666_v4, %v1579_v20 }
 0x2bd   : > { %v681_v12 = vcombine.low %v657_v5, %v673_v8  ;;  %v682_v14 = vcombine.high %v657_v5, %v673_v8  ;;  %v683_v15 = vcombine.low %v664_v6, %v680_v10  ;;  %v684_v16 = vcombine.high %v664_v6, %v680_v10 }
 0x2bf   : > { %v940_v19 = vpack.c.bf16 %v681_v12, %v681_v12  ;;  %v941_v21 = vpack.c.bf16 %v682_v14, %v682_v14  ;;  %v942_v26 = vpack.c.bf16 %v683_v15, %v683_v15  ;;  %v943_v27 = vpack.c.bf16 %v684_v16, %v684_v16 }
 0x2c1   : > { %v949_v24 = vsel %vm947_vm4, %v940_v19, 0  ;;  %v995_v25 = vsel %vm947_vm4, %v941_v21, 0  ;;  %v1041_v22 = vsel %vm947_vm4, %v942_v26, 0  ;;  %v1087_v23 = vsel %vm947_vm4, %v943_v27, 0 }
 0x2c2   : > { %1438 = vmatpush3.bf16.msra.mxu0 %v949_v24  ;;  %1444 = vmatpush3.bf16.msra.mxu1 %v995_v25 }
 0x2c3   : > { %1449 = vmatprep.subr.bf16.mxu0 %v1507_v2  ;;  %1455 = vmatprep.subr.bf16.mxu1 %v1507_v2 }
 0x2c5   : > { %1440 = vmatmul.mubr.msk.bf16.vlgmr.msra.gmra.mrb[8].mxu0 %vm693_vm1, %v936_v28  ;;  %1446 = vmatmul.mubr.msk.bf16.vlgmr.msra.gmra.mrb[8].mxu1 %vm693_vm1, %v937_v29 }
 0x2c6   : > { %1450 = vmatpush3.bf16.msra.mxu0 %v1041_v22  ;;  %1456 = vmatpush3.bf16.msra.mxu1 %v1087_v23 }
 0x2c7   : > { %1451 = vmatprep.mubr.msk.bf16.mxu0 %vm1508_vm0, %v1507_v2  ;;  %1457 = vmatprep.mubr.msk.bf16.mxu1 %vm1508_vm0, %v1507_v2 }
 0x2dc   : > { %v927_v30 = vpop.xlane.xlu0 %926 }
 0x2dd   : > { %v924_v31 = vpop.xlane.xlu1 %923  ;;  %1492 = vrcp.f32 %v927_v30 }
 0x2de   : > { %1494 = vrcp.f32 %v924_v31 }
 0x2e7   : > { %v1493_v34 = vpop.eup %1492 }
 0x2e8   : > { %v1495_v35 = vpop.eup %1494  ;;  %v935_v36 = vmul.f32 %v1493_v34, %v1661_v32 }
 0x2e9   : > { %v934_v37 = vmul.f32 %v1495_v35, %v1663_v33 }
 0x2ea   : > { %v939_v38 = vpack.c.bf16 %v935_v36, %v935_v36 }
 0x2eb   : > { %v938_v39 = vpack.c.bf16 %v934_v37, %v934_v37 }
 0x2ec   : > { %1458 = vmatmul.mubr.msk.bf16.vlgmr.msra.gmra.mrb[12].mxu1 %vm693_vm1, %v939_v38 }
 0x2ed   : > { %1452 = vmatmul.mubr.msk.bf16.vlgmr.msra.gmra.mrb[12].mxu0 %vm693_vm1, %v938_v39 }
 0x398   : > { %v985_v40 = vpop.f32.mrb[8].mxu0  ;;  %v1031_v41 = vpop.f32.mrb[8].mxu1 }
 0x399   : > { %v1441_v42 = vpop.f32.mrb[9].mxu0  ;;  %v1447_v2 = vpop.f32.mrb[9].mxu1 }
 0x39a   : > { %v988_v43 = vpop.f32.mrb[10].mxu0  ;;  %v1034_v44 = vpop.f32.mrb[10].mxu1 }
 0x39b   : > { %v1442_v45 = vpop.f32.mrb[11].mxu0  ;;  %v1448_v46 = vpop.f32.mrb[11].mxu1 }
 0x3bf   : > { %v1123_v47 = vpop.f32.mrb[12].mxu1 }
 0x3c0   : > { %v1077_v48 = vpop.f32.mrb[12].mxu0  ;;  %v1145_v49 = vcombine.low %v1031_v41, %v1123_v47  ;;  %v1146_v32 = vcombine.high %v1031_v41, %v1123_v47  ;;  %v1459_v50 = vpop.f32.mrb[13].mxu1 }
 0x3c1   : > { %v1129_v33 = vcombine.low %v985_v40, %v1077_v48  ;;  %v1130_v51 = vcombine.high %v985_v40, %v1077_v48  ;;  %v1453_v52 = vpop.f32.mrb[13].mxu0  ;;  %v1126_v53 = vpop.f32.mrb[14].mxu1 }
 0x3c2   : > { %v1153_v54 = vrot.slane %v1145_v49, %v1576_v13  ;;  %v1160_v55 = vrot.slane %v1146_v32, %v1576_v13  ;;  %v1080_v56 = vpop.f32.mrb[14].mxu0  ;;  %v1460_v57 = vpop.f32.mrb[15].mxu1 }
 0x3c3   : > { %v1137_v58 = vrot.slane %v1129_v33, %v1576_v13  ;;  %v1144_v59 = vrot.slane %v1130_v51, %v1576_v13  ;;  %v1454_v9 = vpop.f32.mrb[15].mxu0 }
 0x3c5   : > { %v1161_v60 = vcombine.low %v1137_v58, %v1153_v54  ;;  %v1162_v61 = vcombine.high %v1137_v58, %v1153_v54  ;;  %v1177_v62 = vcombine.low %v1144_v59, %v1160_v55  ;;  %v1178_v63 = vcombine.high %v1144_v59, %v1160_v55 }
 0x3c7   : > { %v1169_v0 = vrot.slane %v1161_v60, %v1579_v20  ;;  %v1176_v1 = vrot.slane %v1162_v61, %v1579_v20  ;;  %v1185_v3 = vrot.slane %v1177_v62, %v1579_v20  ;;  %v1192_v4 = vrot.slane %v1178_v63, %v1579_v20 }
 0x3c9   : > { %v1197_v5 = vcombine.low %v1169_v0, %v1176_v1  ;;  %v1393_v6 = vcombine.high %v1169_v0, %v1176_v1  ;;  %v1213_v7 = vcombine.low %v1185_v3, %v1192_v4  ;;  %v1394_v8 = vcombine.high %v1185_v3, %v1192_v4 }
 0x3cb   : > { %v1204_v10 = vrot.slane %v1197_v5, %v1576_v13  ;;  %v1212_v11 = vrot.slane %v1393_v6, %v1576_v13  ;;  %v1220_v12 = vrot.slane %v1213_v7, %v1576_v13  ;;  %v1228_v14 = vrot.slane %v1394_v8, %v1576_v13 }
 0x3cd   : > { %v1230_v15 = vcombine.high %v1204_v10, %v1212_v11  ;;  %v1246_v16 = vcombine.high %v1220_v12, %v1228_v14  ;;  %v1229_v17 = vcombine.low %v1204_v10, %v1212_v11  ;;  %v1245_v18 = vcombine.low %v1220_v12, %v1228_v14 }
 0x3cf   : > { %v1244_v19 = vrot.slane %v1230_v15, %v1579_v20  ;;  %v1260_v21 = vrot.slane %v1246_v16, %v1579_v20  ;;  %v1237_v24 = vrot.slane %v1229_v17, %v1579_v20  ;;  %v1253_v25 = vrot.slane %v1245_v18, %v1579_v20 }
 0x3d1   : > { %v1263_v26 = vcombine.low %v1244_v19, %v1260_v21  ;;  %v1262_v27 = vcombine.high %v1237_v24, %v1253_v25  ;;  %v1264_v28 = vcombine.high %v1244_v19, %v1260_v21  ;;  %v1261_v29 = vcombine.low %v1237_v24, %v1253_v25 }
 0x3d3   : > { %1270 = vrot.lane.b32.xlu1 %v1263_v26, %s1512_s7  ;;  %1266 = vrot.lane.b32.xlu0 %v1262_v27, %s1513_s8 }
 0x3d7   : > { %1274 = vrot.lane.b32.xlu1 %v1264_v28, %s1514_s9 }
 0x445   : > { %v1271_v13 = vpop.permute.xlu1 %1270  ;;  %v1267_v22 = vpop.permute.xlu0 %1266 }
 0x446   : > { %v1277_v23 = vsel %vm693_vm1, %v1261_v29, %v1267_v22 }
 0x447   : > { %v1279_v30 = vsel %vm1278_vm5, %v1277_v23, %v1271_v13 }
 0x449   : > { %v1275_v20 = vpop.permute.xlu1 %1274 }
 0x44a   : > { %v1281_v31 = vsel %vm1280_vm6, %v1279_v30, %v1275_v20 }
 0x44b   : > { %1283 = vst.msk [vmem:[%s240_s12] sm:$0xff] %vm1282_vm7, %v1281_v31 }
 0x44c PF: > { %s14_s15 = sadd.s32 1, %s1502_s15  }
 0x44d   : > { %p11_p4 = scmp.ge.s32.totalorder %s14_s15, 4  }
 0x44f   :  { %13 = sbr.rel (!%p11_p4) target bundleno = 1 (0x1), region = 75 }

// kernel: transformer_forward.49
= control target key start
LH: loop header
LB: loop body
LE: loop exit
PB: predicated region body
PF: predicated region fallthrough
CT: control target
= control target key end

     0   :  { %v152_v1 = vmov 0.0   ;;  %vm153_vm0 = vmmov 0   ;;  %s204_s0 = inlined_call_operand.vmem [shape: f32[16,32], index: 0, kind: input, shape index: {}]   ;;  %s205_s1 = inlined_call_operand.vmem [shape: bf16[32,18], index: 1, kind: input, shape index: {}]   ;;  %s206_s2 = inlined_call_operand.vmem [shape: f32[1,18], index: 2, kind: input, shape index: {}]   ;;  %s207_s3 = inlined_call_operand.hbm [shape: f32[16,18], index: 3, kind: output, shape index: {}]  }
   0x1   :  { %v126_v0 = vld [vmem:[%s205_s1] sm:$0xff]   ;;  %113 = vmatprep.subr.bf16.mxu0 %v152_v1  ;;  %v127_v2 = vld [vmem:[%s205_s1 + $0x8] sm:$0xff]   ;;  %117 = vmatprep.mubr.msk.bf16.mxu0 %vm153_vm0, %v152_v1 }
   0x2   :  { %114 = vmatpush3.bf16.msra.mxu0 %v126_v0  ;;  %v16_v3 = vld [vmem:[%s204_s0] sm:$0xff]  ;;  %v17_v4 = vld [vmem:[%s204_s0 + $0x8] sm:$0xff] }
   0x3   :  { %115 = vmatprep.subr.bf16.mxu0 %v152_v1 }
   0x4   :  { %8 = vsyncpa [#allocation3], 0  ;;  %v18_v5 = vpack.c.bf16 %v17_v4, %v16_v3  ;;  %vm42_vm1 = vcmask 261120   ;;  %v106_v6 = vld [vmem:[%s206_s2] ss:$0 sm:$0xff]  ;;  %s154_s1 = smov [#allocation2]  }
   0x5   :  { %s95_s22 = sshll.u32 %s154_s1, 4  ;;  %vm87_vm2 = vcmask 146432   ;;  %s96_s22 = int_to_ptr.vmem [resolvable:$true] %s95_s22 }
   0x6   :  { %116 = vmatpush3.bf16.msra.mxu0 %v127_v2  ;;  %s128_s0 = scalar_lea.vmem %s96_s22, 256  ;;  %p133_p1 = scmp.lt.s32.totalorder %s96_s22, %s96_s22 }
   0x7   :  { %p129_p0 = scmp.ne.s32.totalorder %s96_s22, %s128_s0  ;;  %p134_p2 = scmp.lt.s32.totalorder %s128_s0, %s128_s0 }
   0x9   :  { %118 = vmatmul.mubr.msk.bf16.vlgmr.msra.gmra.mrb[0].mxu0 %vm42_vm1, %v18_v5  ;;  %p135_p3 = por %p134_p2, %p133_p1 }
   0xb   :  { %p136_p4 = pnand %p135_p3, %p129_p0 }
  0xdc   :  { %v80_v7 = vpop.f32.mrb[0].mxu0 }
  0xdd   :  { %v81_v8 = vadd.f32 %v106_v6, %v80_v7  ;;  %v119_v9 = vpop.f32.mrb[1].mxu0 }
  0xde   :  { %v83_v10 = vpop.f32.mrb[2].mxu0 }
  0xdf   :  { %88 = vst.msk [vmem:[#allocation2] sm:$0xff] %vm87_vm2, %v81_v8  ;;  %v84_v11 = vadd.f32 %v106_v6, %v83_v10  ;;  %v120_v12 = vpop.f32.mrb[3].mxu0 }
  0xe1   :  { %89 = vst.msk [vmem:[#allocation2 + $0x8] sm:$0xff] %vm87_vm2, %v84_v11 }
  0xe2   :  { %139 = shalt.err (!%p136_p4)
}
  0xe3   :  { %s140_s24 = scalar_lea.hbm %s207_s3, 256 }
  0xe4   :  { %p141_p5 = scmp.ne.s32.totalorder %s207_s3, %s140_s24  ;;  %p144_p6 = scmp.lt.u32.totalorder %s140_s24, %s207_s3 }
  0xe6   :  { %p146_p7 = pnand %p144_p6, %p141_p5 }
  0xe8   :  { %149 = shalt.err (!%p146_p7)
}
  0xe9   :  { %s155_s29 = smov 128   ;;  %s156_s30 = smov 8  }
  0xea   :  { %101 = dma.vmem_to_hbm [thread:$0]  %s96_s22, 256, %s207_s3, [#allocation3], %s155_s29, %s155_s29, %s156_s30  }
  0xeb   :  { %150 = dma.done.wait [#allocation3], 256  }
  0xec   :  { %151 = vsyncadd [#allocation3], 4294967040 }
  0xed   :  { %105 = vsyncpa [#allocation3], 1 }

</bundles_post_ra>
